<compile_context>
chip_gen: v6e
topology: v6e:2x2x1
jax: 0.10.0
libtpu: 0.0.40
codegen_flags: <defaults>
</compile_context>

<pallas_src>
import math

import jax
import jax.numpy as jnp
import numpy as np
from jax.experimental import pallas as pl
from jax.experimental.pallas import tpu as pltpu


def make_gaussian_taps_1d(kernel_size, sigma):
    """Normalized 1-D taps; outer(taps, taps) == the torch 2-D kernel,
    because the 2-D normalization factor factorizes over the two axes."""
    mean = (kernel_size - 1) / 2
    g = [
        1.0 / (sigma * math.sqrt(2.0 * math.pi))
        * math.exp(-(((i - mean) / (2.0 * sigma)) ** 2))
        for i in range(kernel_size)
    ]
    s = sum(g)
    return [v / s for v in g]


def make_gaussian_weight(channels, kernel_size, sigma, dim=2):
    """Reproduces the torch __init__ weight construction (dim=2).
    Used only by the pure-JAX reference check."""
    if isinstance(kernel_size, (int, float)):
        kernel_size = [int(kernel_size)] * dim
    if isinstance(sigma, (int, float)):
        sigma = [float(sigma)] * dim
    coords = [jnp.arange(k, dtype=jnp.float32) for k in kernel_size]
    meshgrids = jnp.meshgrid(*coords, indexing="ij")
    kernel = jnp.ones((), dtype=jnp.float32)
    for size, std, mgrid in zip(kernel_size, sigma, meshgrids):
        mean = (size - 1) / 2
        kernel = kernel * (
            1.0 / (std * math.sqrt(2 * math.pi))
            * jnp.exp(-(((mgrid - mean) / (2 * std)) ** 2))
        )
    kernel = kernel / jnp.sum(kernel)
    weight = jnp.broadcast_to(kernel[None, :, :], (channels,) + kernel.shape)
    return weight, kernel_size


def _band_matrix(n, taps, pad):
    """Banded-Toeplitz 'same'-conv operator: B[i, j] = taps[j - i + pad]."""
    K = len(taps)
    B = np.zeros((n, n), dtype=np.float64)
    for i in range(n):
        for d in range(K):
            j = i + d - pad
            if 0 <= j < n:
                B[i, j] = taps[d]
    return B


def _blur_kernel(x_ref, mt_ref, o_ref):
    # x_ref : (1, C, H*W)   mt_ref : (H*W, H*W)   o_ref : (1, C, H*W)
    # Single MXU matmul, lane-dense load and store: out_flat = X_flat @ M^T.
    o_ref[0] = jnp.dot(
        x_ref[0].astype(jnp.float32),
        mt_ref[...],
        precision=jax.lax.Precision.HIGHEST,
        preferred_element_type=jnp.float32,
    ).astype(o_ref.dtype)


def gaussian_smoothing(x, kernel_size, sigma):
    """Depthwise 'same' Gaussian blur. x: (N, C, H, W). Matches the torch
    module's forward (F.conv2d, groups=C, zero padding (K-1)//2)."""
    N, C, H, W = x.shape
    K = int(kernel_size)
    assert K % 2 == 1, "kernel_size must be odd for symmetric 'same' padding"
    pad = (K - 1) // 2
    HW = H * W

    # Combined blur operator M = kron(A_h, A_w): out_flat[c] = M @ x_flat[c].
    # Built in float64 on host, cast once to f32.
    taps = make_gaussian_taps_1d(K, float(sigma))
    A_h = _band_matrix(H, taps, pad)
    A_w = _band_matrix(W, taps, pad)
    M = np.kron(A_h, A_w)                        # (H*W, H*W)
    mt = jnp.asarray(M.T, dtype=jnp.float32)     # RHS of X_flat @ M^T

    # This path is for small spatial dims where the combined operator fits
    # comfortably in VMEM (see TODO at top for the large-H/W separable path).
    assert HW * HW * 4 <= 8 * 1024 * 1024, (
        "kron operator too large for VMEM; use the separable banded form")

    # Free contiguous reshape in the wrapper: lane dim becomes H*W (x128).
    x_flat = x.reshape(N, C, HW)

    out_flat = pl.pallas_call(
        _blur_kernel,
        out_shape=jax.ShapeDtypeStruct((N, C, HW), x.dtype),
        grid_spec=pltpu.PrefetchScalarGridSpec(
            num_scalar_prefetch=0,
            grid=(N,),                            # >=2 parallel steps keeps
            in_specs=[                            # both v7x TCs busy.
                pl.BlockSpec((1, C, HW), lambda n: (n, 0, 0)),
                pl.BlockSpec((HW, HW), lambda n: (0, 0)),   # constant operator
            ],
            out_specs=pl.BlockSpec((1, C, HW), lambda n: (n, 0, 0)),
        ),
        compiler_params=pltpu.CompilerParams(
            dimension_semantics=("parallel",),
        ),
    )(x_flat, mt)

    return out_flat.reshape(N, C, H, W)


def _reference(x, weight, kernel_size):
    """Pure-JAX reference: grouped conv2d, padding=(K-1)//2 (== F.conv2d)."""
    C = x.shape[1]
    K = kernel_size[0]
    pad = int((K - 1) / 2)
    w = weight[:, None, :, :]  # (C, 1, K, K) == torch OIHW depthwise weight
    return jax.lax.conv_general_dilated(
        x, w,
        window_strides=(1, 1),
        padding=((pad, pad), (pad, pad)),
        dimension_numbers=("NCHW", "OIHW", "NCHW"),
        feature_group_count=C,
        precision=jax.lax.Precision.HIGHEST,
    )


if __name__ == "__main__":
    N, C, H, W = 2, 4, 16, 16
    kernel_size = 5
    sigma = 1.0

    key = jax.random.PRNGKey(0)
    x = jax.random.normal(key, (N, C, H, W), dtype=jnp.float32)

    out = jax.block_until_ready(gaussian_smoothing(x, kernel_size, sigma))

    weight, ks = make_gaussian_weight(C, kernel_size, sigma, dim=2)
    ref = jax.block_until_ready(_reference(x, weight, ks))
    np.testing.assert_allclose(np.asarray(out), np.asarray(ref),
                               rtol=1e-4, atol=1e-5)
    print("KERNEL_OK")
</pallas_src>

<mosaic_0001>
module attributes {stable_mosaic.version = 11 : i64} {
  func.func @_blur_kernel(%arg0: i32, %arg1: memref<1x4x256xf32, #tpu.memory_space<vmem>>, %arg2: memref<256x256xf32, #tpu.memory_space<vmem>>, %arg3: memref<1x4x256xf32, #tpu.memory_space<vmem>>) attributes {dimension_semantics = [#tpu.dimension_semantics<parallel>], iteration_bounds = array<i64: 2>, scalar_prefetch = 0 : i64, scratch_operands = 0 : i64, tpu.core_type = #tpu.core_type<tc>, window_params = [{transform_indices = @transform_0, window_bounds = array<i64: 1, 4, 256>}, {pipeline_mode = #tpu.pipeline_mode<synchronous>, transform_indices = @transform_1, window_bounds = array<i64: 256, 256>}, {transform_indices = @transform_2, window_bounds = array<i64: 1, 4, 256>}]} {
    %c0 = arith.constant 0 : index
    %c0_0 = arith.constant 0 : index
    %c0_1 = arith.constant 0 : index
    %0 = vector.load %arg1[%c0, %c0_0, %c0_1] : memref<1x4x256xf32, #tpu.memory_space<vmem>>, vector<1x4x256xf32>
    %1 = vector.shape_cast %0 : vector<1x4x256xf32> to vector<4x256xf32>
    %c0_2 = arith.constant 0 : index
    %c0_3 = arith.constant 0 : index
    %2 = vector.load %arg2[%c0_2, %c0_3] : memref<256x256xf32, #tpu.memory_space<vmem>>, vector<256x256xf32>
    %cst = arith.constant dense<0.000000e+00> : vector<4x256xf32>
    %3 = tpu.matmul %1, %2, %cst {dimension_numbers = #tpu.dot_dimension_numbers<[1], [0], [0], [1], [0, 0, 1, 1], [], []>, precision = #tpu.contract_precision<fp32>} : vector<4x256xf32>, vector<256x256xf32>, vector<4x256xf32> -> vector<4x256xf32>
    %c0_4 = arith.constant 0 : index
    %c0_5 = arith.constant 0 : index
    %c0_6 = arith.constant 0 : index
    %4 = vector.load %arg3[%c0_4, %c0_5, %c0_6] : memref<1x4x256xf32, #tpu.memory_space<vmem>>, vector<1x4x256xf32>
    %5 = vector.shape_cast %4 : vector<1x4x256xf32> to vector<4x256xf32>
    %6 = vector.shape_cast %3 : vector<4x256xf32> to vector<1x4x256xf32>
    tpu.vector_store %arg3[%c0_4, %c0_5, %c0_6], %6 {strides = array<i32>} : memref<1x4x256xf32, #tpu.memory_space<vmem>>, vector<1x4x256xf32>,
    return
  }
  func.func @transform_0(%arg0: i32) -> (i32, i32, i32) {
    %c0_i32 = arith.constant 0 : i32
    %c0_i32_0 = arith.constant 0 : i32
    %c0_i32_1 = arith.constant 0 : i32
    return %arg0, %c0_i32, %c0_i32_0 : i32, i32, i32
  }
  func.func @transform_1(%arg0: i32) -> (i32, i32) {
    %c0_i32 = arith.constant 0 : i32
    %c0_i32_0 = arith.constant 0 : i32
    %c0_i32_1 = arith.constant 0 : i32
    return %c0_i32, %c0_i32_0 : i32, i32
  }
  func.func @transform_2(%arg0: i32) -> (i32, i32, i32) {
    %c0_i32 = arith.constant 0 : i32
    %c0_i32_0 = arith.constant 0 : i32
    %c0_i32_1 = arith.constant 0 : i32
    return %arg0, %c0_i32, %c0_i32_0 : i32, i32, i32
  }
}

</mosaic_0001>

<bundles_post_ra>
// kernel: tpu_custom_call.1
= control target key start
LH: loop header
LB: loop body
LE: loop exit
PB: predicated region body
PF: predicated region fallthrough
CT: control target
= control target key end

     0   :  { %7 = vsyncpa [#allocation3], 0  ;;  %s3220_s0 = inlined_call_operand.hbm [shape: f32[2,4,256], index: 0, kind: input, shape index: {}]   ;;  %s3221_s1 = inlined_call_operand.hbm [shape: f32[256,256], index: 1, kind: input, shape index: {}]   ;;  %s3222_s2 = inlined_call_operand.hbm [shape: f32[2,4,256], index: 2, kind: output, shape index: {}]  }
   0x1   :  { %9 = vsyncpa [#allocation3 + $0x1], 0 }
   0x2   :  { %10 = vsyncpa [#allocation6], 0 }
   0x3   :  { %11 = vsyncpa [#allocation4], 0 }
   0x4   :  { %13 = vsyncpa [#allocation4 + $0x1], 0  ;;  %s1849_s9 = smov 0   ;;  %s1851_s10 = smov 0  }
   0x5   :  { %s1853_s11 = smov 0   ;;  %s1855_s12 = smov 0  }
   0x6 LB: > { %s1870_s13 = sadd.s32 4294967295, %s1827_s12   ;;  %s1627_s14 = sadd.s32 4294967294, %s1827_s12   ;;  %s1827_s12 = sphi %s1855_s12, %s3792_s12   ;;  %s1823_s11 = sphi %s1853_s11, %s3791_s11   ;;  %s1819_s10 = sphi %s1851_s10, %s3790_s10   ;;  %s1815_s9 = sphi %s1849_s9, %s3789_s9  }
   0x7   : > { %p39_p0 = scmp.ne.s32.totalorder %s1819_s10, %s1815_s9  ;;  %p3223_p1 = scmp.eq.s32.totalorder %s1870_s13, 0 }
   0x8   : > { %p90_p3 = scmp.eq.s32.totalorder %s1627_s14, 1  ;;  %p1628_p5 = scmp.ge.s32.totalorder %s1827_s12, 1 }
   0x9   : > { %p1879_p4 = por %p3223_p1, %p39_p0  ;;  %p97_p7 = scmp.lt.s32.totalorder %s1827_s12, 3 }
   0xa   : > { %p1884_p6 = por %p90_p3, %p39_p0  ;;  %s1829_s18 = smov [#allocation5]  }
   0xb   : > { %s3434_s15 = scalar_select %p1879_p4, 1, 0 }
   0xc   : > { %s3435_s16 = scalar_select %p1884_p6, 1, 0 }
   0xd   : > { %p1889_p8 = pnand %p1628_p5, %p97_p7  ;;  %s109_s19 = sshll.u32 %s1829_s18, 4  ;;  %s110_s19 = int_to_ptr.vmem [resolvable:$true] %s109_s19 }
   0xe   : > { %s1903_s21 = sadd.s32 1, %s1827_s12   ;;  %s26_s22 = sadd.s32 1, %s1823_s11 }
   0xf   : > { %s3436_s17 = scalar_select %p1889_p8, 1, 0 }
  0x10   : > { %p1653_p9 = pneg %p1889_p8  ;;  %s23_s23 = ssub.s32 %s1827_s12, %s1903_s21 }
  0x11   : > { %s1716_s24 = scalar_lea.vmem %s110_s19, 8192  ;;  %p1724_p5 = scmp.lt.s32.totalorder %s110_s19, %s110_s19 }
  0x12   : > { %p1898_p11 = pnand %p1653_p9, %p3223_p1  ;;  %p1717_p13 = scmp.ne.s32.totalorder %s110_s19, %s1716_s24 }
  0x13   : > { %p1725_p7 = scmp.lt.s32.totalorder %s1716_s24, %s1716_s24 }
  0x14   : > { %p1707_p12 = pneg %p1898_p11 }
  0x15   : > { %p1726_p10 = por %p1725_p7, %p1724_p5 }
  0x16   : > { %p1719_p0 = pnand %p1717_p13, %p1707_p12 }
  0x18   : > { %p1720_p3 = pneg %p1719_p0 }
  0x1a   : > { %p1727_p2 = pnand %p1726_p10, %p1720_p3 }
  0x1c   : > { %1730 = shalt.err (!%p1727_p2)
}
  0x1d   : > { %s1830_s25 = smov 256   ;;  %s1831_s26 = smov 16  }
  0x1e   : > { %1656 = dma.hbm_to_vmem [thread:$0]  (!%p1898_p11), %s3221_s1, 8192, %s110_s19, [#allocation6], %s1830_s25, %s1830_s25, %s1831_s26  }
  0x1f   : > { %p24_p9 = scmp.eq.s32.totalorder %s23_s23, 0  ;;  %p33_p12 = scmp.ne.s32.totalorder %s1823_s11, %s1819_s10 }
  0x20   : > { %p34_p10 = scmp.eq.s32.totalorder %s1827_s12, 0  ;;  %p1666_p2 = scmp.lt.s32.totalorder %s1827_s12, 2 }
  0x21   : > { %s1920_s29 = scalar_select %p24_p9, %s1823_s11, %s26_s22  }
  0x22   : > { %p35_p13 = por %p34_p10, %p33_p12  ;;  %p3438_p0 = scmp.eq.s32.totalorder %s1870_s13, 1 }
  0x23   : > { %s123_s3 = sand.u32 1, %s1823_s11   ;;  %s1643_s4 = sshll.u32 %s1827_s12, 7 }
  0x24   : > { %p1924_p3 = por %p3438_p0, %p33_p12  ;;  %s1631_s5 = sshll.u32 %s123_s3, 3 }
  0x25   : > { %s1933_s8 = scalar_lea.hbm %s3220_s0, %s1643_s4  ;;  %s127_s14 = scalar_lea.vmem [#allocation2], %s1631_s5 }
  0x26   : > { %s3439_s30 = scalar_select %p1924_p3, 1, 0 }
  0x27   : > { %s135_s18 = sshll.u32 %s127_s14, 4  ;;  %p1935_p11 = pnand %p1666_p2, %p35_p13  ;;  %s136_s18 = int_to_ptr.vmem [resolvable:$true] %s135_s18 }
  0x28   : > { %s124_s20 = scalar_lea.sflag [#allocation3], %s123_s3  ;;  %s1731_s22 = scalar_lea.hbm %s1933_s8, 128 }
  0x29   : > { %p1732_p5 = scmp.ne.s32.totalorder %s1933_s8, %s1731_s22  ;;  %p1733_p7 = pneg %p1935_p11 }
  0x2a   : > { %s1736_s25 = scalar_lea.hbm %s3220_s0, 256  ;;  %p1737_p10 = scmp.lt.s32.totalorder %s1933_s8, %s3220_s0 }
  0x2b   : > { %p1734_p9 = pnand %p1733_p7, %p1732_p5  ;;  %p1738_p2 = scmp.lt.s32.totalorder %s1736_s25, %s1731_s22 }
  0x2d   : > { %p1735_p12 = pneg %p1734_p9  ;;  %p1739_p13 = por %p1738_p2, %p1737_p10 }
  0x2f   : > { %p1740_p0 = pnand %p1739_p13, %p1735_p12 }
  0x31   : > { %1743 = shalt.err (!%p1740_p0)
}
  0x32   : > { %s1744_s28 = scalar_lea.vmem %s136_s18, 128  ;;  %s1832_s3 = smov [#allocation2]  }
  0x33   : > { %p1745_p1 = scmp.ne.s32.totalorder %s136_s18, %s1744_s28  ;;  %s1749_s4 = sshll.u32 %s1832_s3, 4  ;;  %s1750_s4 = int_to_ptr.vmem [resolvable:$false] %s1749_s4 }
  0x34   : > { %s1751_s5 = scalar_lea.vmem %s1750_s4, 256  ;;  %p1752_p5 = scmp.lt.s32.totalorder %s136_s18, %s1750_s4 }
  0x35   : > { %p1747_p6 = pnand %p1745_p1, %p1733_p7  ;;  %p1753_p9 = scmp.lt.s32.totalorder %s1751_s5, %s1744_s28 }
  0x37   : > { %p1748_p3 = pneg %p1747_p6  ;;  %p1754_p4 = por %p1753_p9, %p1752_p5 }
  0x39   : > { %p1755_p8 = pnand %p1754_p4, %p1748_p3 }
  0x3b   : > { %1758 = shalt.err (!%p1755_p8)
}
  0x3c   : > { %1660 = dma.hbm_to_vmem [thread:$0]  (!%p1935_p11), %s1933_s8, 128, %s136_s18, %s124_s20  }
  0x3d   : > { %p3441_p12 = scmp.ne.s32.totalorder %s3436_s17, 0 }
  0x3f   : > { %144 = sbr.rel (%p3441_p12) target bundleno = 515 (0x203), region = 28 }
  0x44   : > { %s1956_s6 = sand.u32 1, %s1819_s10   ;;  %p3442_p1 = scmp.ne.s32.totalorder %s3434_s15, 0 }
  0x45   : > { %s1635_s7 = sshll.u32 %s1956_s6, 3  ;;  %s147_s14 = scalar_lea.sflag [#allocation3], %s1956_s6 }
  0x46   : > { %s1962_s22 = scalar_lea.vmem [#allocation2], %s1635_s7 }
  0x47   : > { %1802 = dma.done.wait (%p3442_p1), %s147_s14, 128  }
  0x48   : > { %1804 = vsyncadd (%p3442_p1), %s147_s14, 4294967168  ;;  %p3443_p4 = scmp.eq.s32.totalorder %s1870_s13, 0 }
  0x4a   : > { %1806 = dma.done.wait (%p3443_p4), [#allocation6], 8192   ;;  %p3444_p6 = pmov %p3443_p4 }
  0x4b   : > { %v207_v0 = vld [vmem:[#allocation5 + $0xf8] sm:$0xff]  ;;  %v206_v1 = vld [vmem:[#allocation5 + $0xf0] sm:$0xff]  ;;  %v205_v2 = vld [vmem:[#allocation5 + $0xe8] sm:$0xff]  ;;  %s1644_s15 = sshll.u32 %s1870_s13, 7  ;;  %s174_s17 = scalar_lea.vmem [#allocation7], %s1635_s7 }
  0x4c   : > { %1808 = vsyncadd (%p3444_p6), [#allocation6], 4294959104  ;;  %v1972_v3 = vand.u32 4294901760, %v207_v0  ;;  %v1974_v4 = vand.u32 4294901760, %v206_v1  ;;  %v1976_v5 = vand.u32 4294901760, %v205_v2  ;;  %v204_v6 = vld [vmem:[#allocation5 + $0xe0] sm:$0xff]  ;;  %s1545_s20 = scalar_lea.hbm %s3222_s2, %s1644_s15 }
  0x4d   : > { %v203_v7 = vld [vmem:[#allocation5 + $0xd8] sm:$0xff]  ;;  %v202_v8 = vld [vmem:[#allocation5 + $0xd0] sm:$0xff]  ;;  %v1978_v9 = vand.u32 4294901760, %v204_v6  ;;  %v201_v12 = vld [vmem:[#allocation5 + $0xc8] sm:$0xff]  ;;  %s1547_s8 = sshll.u32 %s174_s17, 4  ;;  %s1533_s23 = scalar_lea.sflag [#allocation4], %s1956_s6  ;;  %s1548_s8 = int_to_ptr.vmem [resolvable:$true] %s1547_s8 }
  0x4e   : > { %v1980_v10 = vand.u32 4294901760, %v203_v7  ;;  %v1982_v11 = vand.u32 4294901760, %v202_v8  ;;  %v200_v13 = vld [vmem:[#allocation5 + $0xc0] sm:$0xff]  ;;  %v199_v14 = vld [vmem:[#allocation5 + $0xb8] sm:$0xff]  ;;  %244 = vmatprep.subr.mxu0 %v1972_v3  ;;  %v1985_v15 = vand.u32 4294901760, %v201_v12  ;;  %v1992_v18 = vsub.f32 %v207_v0, %v1972_v3  ;;  %v1994_v19 = vld [vmem:[#allocation5 + $0xb0] sm:$0xff] }
  0x4f   : > { %v1987_v16 = vand.u32 4294901760, %v200_v13  ;;  %v1989_v17 = vand.u32 4294901760, %v199_v14  ;;  %v1996_v20 = vld [vmem:[#allocation5 + $0xa8] sm:$0xff]  ;;  %v1998_v21 = vld [vmem:[#allocation5 + $0xa0] sm:$0xff]  ;;  %246 = vmatpush1.msra.mxu0 %v1974_v4  ;;  %v2002_v22 = vand.u32 4294901760, %v1994_v19  ;;  %v2005_v23 = vsub.f32 %v206_v1, %v1974_v4  ;;  %v2013_v26 = vld [vmem:[#allocation5 + $0x98] sm:$0xff] }
  0x50   : > { %3445 = vst [vmem:[#allocation11_spill] sm:$0xff] %v1992_v18  ;;  %v2008_v24 = vand.u32 4294901760, %v1996_v20  ;;  %v2011_v25 = vsub.f32 %v205_v2, %v1976_v5  ;;  %v2015_v27 = vld [vmem:[#allocation5 + $0x90] sm:$0xff]  ;;  %v2017_v28 = vld [vmem:[#allocation5 + $0x88] sm:$0xff]  ;;  %248 = vmatprep.subr.mxu0 %v1976_v5  ;;  %v3240_v29 = vand.u32 4294901760, %v1992_v18  ;;  %v2022_v30 = vand.u32 4294901760, %v1998_v21 }
  0x51   : > { %v2025_v31 = vsub.f32 %v204_v6, %v1978_v9  ;;  %v2028_v32 = vand.u32 4294901760, %v2013_v26  ;;  %250 = vmatpush1.msra.mxu0 %v1978_v9  ;;  %v3238_v33 = vand.u32 4294901760, %v2005_v23  ;;  %v2034_v35 = vsub.f32 %v203_v7, %v1980_v10  ;;  %v2039_v37 = vld [vmem:[#allocation5 + $0x80] sm:$0xff]  ;;  %v2063_v46 = vld [vmem:[#allocation5 + $0x78] sm:$0xff]  ;;  %v2073_v51 = vld [vmem:[#allocation5 + $0x70] sm:$0xff]  ;;  %s1759_s24 = scalar_lea.vmem %s1548_s8, 128 }
  0x52   : > { %3446 = vst [vmem:[#allocation12_spill] sm:$0xff] %v2022_v30  ;;  %v3237_v34 = vand.u32 4294901760, %v2011_v25  ;;  %v2037_v36 = vand.u32 4294901760, %v2015_v27  ;;  %252 = vmatprep.subr.mxu0 %v1980_v10  ;;  %v391_v38 = vsub.f32 %v1992_v18, %v3240_v29  ;;  %v2047_v40 = vsub.f32 %v202_v8, %v1982_v11  ;;  %v2080_v56 = vld [vmem:[#allocation5 + $0x68] sm:$0xff]  ;;  %v2092_v61 = vld [vmem:[#allocation5 + $0x60] sm:$0xff]  ;;  %v2104_v2 = vld [vmem:[#allocation5 + $0x58] sm:$0xff]  ;;  %p1760_p8 = scmp.ne.s32.totalorder %s1548_s8, %s1759_s24 }
  0x53   : > { %3447 = vst [vmem:[#allocation13_spill] sm:$0xff] %v2028_v32  ;;  %v3235_v39 = vand.u32 4294901760, %v2025_v31  ;;  %v2050_v41 = vand.u32 4294901760, %v2017_v28  ;;  %254 = vmatpush1.msra.mxu0 %v1982_v11  ;;  %v397_v42 = vsub.f32 %v2005_v23, %v3238_v33  ;;  %v3233_v44 = vand.u32 4294901760, %v2034_v35  ;;  %p3786_p3 = scmp.ne.s32.totalorder %s3439_s30, 0  ;;  %s1833_s25 = smov [#allocation7]  }
  0x54   : > { %3448 = vst [vmem:[#allocation14_spill] sm:$0xff] %v2037_v36  ;;  %v403_v43 = vsub.f32 %v2011_v25, %v3237_v34  ;;  %v2061_v45 = vsub.f32 %v201_v12, %v1985_v15  ;;  %256 = vmatprep.subr.mxu0 %v1985_v15  ;;  %v392_v47 = vand.u32 4294901760, %v391_v38  ;;  %v3232_v49 = vand.u32 4294901760, %v2047_v40  ;;  %v2205_v34 = vld [vmem:[#allocation5 + $0x20] sm:$0xff]  ;;  %s1763_s13 = sshll.u32 %s1833_s25, 4  ;;  %s1764_s13 = int_to_ptr.vmem [resolvable:$false] %s1763_s13 }
  0x55   : > { %3449 = vst [vmem:[#allocation15_spill] sm:$0xff] %v2050_v41  ;;  %v409_v48 = vsub.f32 %v2025_v31, %v3235_v39  ;;  %v2071_v50 = vand.u32 4294901760, %v2039_v37  ;;  %258 = vmatpush1.msra.mxu0 %v1987_v16  ;;  %v398_v52 = vand.u32 4294901760, %v397_v42  ;;  %v415_v54 = vsub.f32 %v2034_v35, %v3233_v44  ;;  %v2195_v39 = vld [vmem:[#allocation5 + $0x28] sm:$0xff]  ;;  %p1761_p11 = pnand %p1760_p8, %p3786_p3  ;;  %s1765_s26 = scalar_lea.vmem %s1764_s13, 256 }
  0x56   : > { %v404_v53 = vand.u32 4294901760, %v403_v43  ;;  %v3230_v55 = vand.u32 4294901760, %v2061_v45  ;;  %260 = vmatprep.subr.mxu0 %v1989_v17  ;;  %393 = vmatprep.subr.mxu1 %v392_v47  ;;  %v421_v58 = vsub.f32 %v2047_v40, %v3232_v49  ;;  %v2087_v59 = vsub.f32 %v200_v13, %v1987_v16  ;;  %v2115_v13 = vld [vmem:[#allocation5 + $0x50] sm:$0xff]  ;;  %p1766_p10 = scmp.lt.s32.totalorder %s1548_s8, %s1764_s13  ;;  %p1767_p2 = scmp.lt.s32.totalorder %s1765_s26, %s1759_s24 }
  0x57   : > { %3450 = vst [vmem:[#allocation16_spill] sm:$0xff] %v2071_v50  ;;  %v410_v57 = vand.u32 4294901760, %v409_v48  ;;  %v2090_v60 = vand.u32 4294901760, %v2063_v46  ;;  %262 = vmatpush1.msra.mxu0 %v2002_v22  ;;  %399 = vmatpush1.msra.mxu1 %v398_v52  ;;  %v416_v62 = vand.u32 4294901760, %v415_v54  ;;  %v2099_v0 = vsub.f32 %v199_v14, %v1989_v17  ;;  %v2182_v49 = vld [vmem:[#allocation5 + $0x30] sm:$0xff]  ;;  %p1762_p7 = pneg %p1761_p11 }
  0x58   : > { %v427_v63 = vsub.f32 %v2061_v45, %v3230_v55  ;;  %v2102_v1 = vand.u32 4294901760, %v2073_v51  ;;  %264 = vmatprep.subr.mxu0 %v2008_v24  ;;  %405 = vmatprep.subr.mxu1 %v404_v53  ;;  %v422_v6 = vand.u32 4294901760, %v421_v58  ;;  %v3228_v7 = vand.u32 4294901760, %v2087_v59  ;;  %p1768_p13 = por %p1767_p2, %p1766_p10 }
  0x59   : > { %3451 = vst [vmem:[#allocation17_spill] sm:$0xff] %v2090_v60  ;;  %v2110_v8 = vsub.f32 %v1994_v19, %v2002_v22  ;;  %v2113_v12 = vand.u32 4294901760, %v2080_v56  ;;  %266 = vmatpush1.msra.mxu0 %v2022_v30  ;;  %411 = vmatpush1.msra.mxu1 %v410_v57  ;;  %v3227_v38 = vand.u32 4294901760, %v2099_v0  ;;  %v2121_v42 = vsub.f32 %v1996_v20, %v2008_v24  ;;  %v2138_v20 = vld [vmem:[#allocation5 + $0x48] sm:$0xff] }
  0x5a   : > { %3452 = vst [vmem:[#allocation18_spill] sm:$0xff] %v2102_v1  ;;  %v428_v14 = vand.u32 4294901760, %v427_v63  ;;  %v2124_v43 = vand.u32 4294901760, %v2092_v61  ;;  %268 = vmatprep.subr.mxu0 %v2028_v32  ;;  %417 = vmatprep.subr.mxu1 %v416_v62  ;;  %v433_v19 = vsub.f32 %v2087_v59, %v3228_v7  ;;  %v2133_v48 = vsub.f32 %v1998_v21, %v2022_v30  ;;  %p1769_p0 = pnand %p1768_p13, %p1762_p7 }
  0x5b   : > { %3453 = vst [vmem:[#allocation19_spill] sm:$0xff] %v2113_v12  ;;  %v3229_v47 = vand.u32 4294901760, %v2110_v8  ;;  %v2136_v52 = vand.u32 4294901760, %v2104_v2  ;;  %270 = vmatpush1.msra.mxu0 %v2037_v36  ;;  %423 = vmatpush1.msra.mxu1 %v422_v6  ;;  %v439_v53 = vsub.f32 %v2099_v0, %v3227_v38  ;;  %v3231_v54 = vand.u32 4294901760, %v2121_v42  ;;  %v2161_v38 = vld [vmem:[#allocation5 + $0x40] sm:$0xff] }
  0x5c   : > { %3454 = vst [vmem:[#allocation20_spill] sm:$0xff] %v2124_v43  ;;  %v2147_v57 = vsub.f32 %v2013_v26, %v2028_v32  ;;  %v2150_v21 = vand.u32 4294901760, %v2115_v13  ;;  %272 = vmatprep.subr.mxu0 %v2050_v41  ;;  %429 = vmatprep.subr.mxu1 %v428_v14  ;;  %v434_v58 = vand.u32 4294901760, %v433_v19  ;;  %v3234_v63 = vand.u32 4294901760, %v2133_v48 }
  0x5d   : > { %3455 = vst [vmem:[#allocation21_spill] sm:$0xff] %v2136_v52  ;;  %v445_v62 = vsub.f32 %v2110_v8, %v3229_v47  ;;  %v2159_v6 = vsub.f32 %v2015_v27, %v2037_v36  ;;  %274 = vmatpush1.msra.mxu0 %v2071_v50  ;;  %v440_v26 = vand.u32 4294901760, %v439_v53  ;;  %v451_v14 = vsub.f32 %v2121_v42, %v3231_v54  ;;  %v2171_v47 = vld [vmem:[#allocation5 + $0x38] sm:$0xff] }
  0x5e   : > { %3456 = vst [vmem:[#allocation22_spill] sm:$0xff] %v2150_v21  ;;  %v3236_v19 = vand.u32 4294901760, %v2147_v57  ;;  %v2169_v7 = vand.u32 4294901760, %v2138_v20  ;;  %435 = vmatpush1.msra.mxu1 %v434_v58  ;;  %276 = vmatprep.subr.mxu0 %v2090_v60  ;;  %v457_v55 = vsub.f32 %v2133_v48, %v3234_v63  ;;  %v2180_v54 = vsub.f32 %v2017_v28, %v2050_v41  ;;  %v2285_v36 = vld [vmem:[#allocation5 + $0x1f8] sm:$0xff] }
  0x5f   : > { %v446_v27 = vand.u32 4294901760, %v445_v62  ;;  %v3239_v53 = vand.u32 4294901760, %v2159_v6  ;;  %441 = vmatprep.subr.mxu1 %v440_v26  ;;  %278 = vmatpush1.msra.mxu0 %v2102_v1  ;;  %v452_v44 = vand.u32 4294901760, %v451_v14  ;;  %v2189_v62 = vand.u32 4294901760, %v2161_v38 }
  0x60   : > { %3457 = vst [vmem:[#allocation23_spill] sm:$0xff] %v2169_v7  ;;  %v463_v58 = vsub.f32 %v2147_v57, %v3236_v19  ;;  %v2193_v63 = vsub.f32 %v2039_v37, %v2071_v50  ;;  %280 = vmatprep.subr.mxu0 %v2113_v12  ;;  %v458_v28 = vand.u32 4294901760, %v457_v55  ;;  %v3243_v14 = vand.u32 4294901760, %v2180_v54 }
  0x61   : > { %3458 = vst [vmem:[#allocation24_spill] sm:$0xff] %v2189_v62  ;;  %447 = vmatpush1.msra.mxu1 %v446_v27  ;;  %v469_v26 = vsub.f32 %v2159_v6, %v3239_v53  ;;  %v2203_v19 = vand.u32 4294901760, %v2171_v47  ;;  %282 = vmatpush1.msra.mxu0 %v2124_v43  ;;  %v2211_v55 = vsub.f32 %v2063_v46, %v2090_v60  ;;  %v2214_v33 = vand.u32 4294901760, %v2182_v49  ;;  %v2216_v53 = vld [vmem:[#allocation5 + $0x18] sm:$0xff] }
  0x62   : > { %453 = vmatprep.subr.mxu1 %v452_v44  ;;  %v464_v37 = vand.u32 4294901760, %v463_v58  ;;  %v3246_v27 = vand.u32 4294901760, %v2193_v63  ;;  %284 = vmatprep.subr.mxu0 %v2136_v52  ;;  %v475_v44 = vsub.f32 %v2180_v54, %v3243_v14  ;;  %v2224_v58 = vsub.f32 %v2073_v51, %v2102_v1  ;;  %v2241_v51 = vld [vmem:[#allocation5 + $0x10] sm:$0xff] }
  0x63   : > { %3459 = vst [vmem:[#allocation25_spill] sm:$0xff] %v2203_v19  ;;  %3460 = vst [vmem:[#allocation26_spill] sm:$0xff] %v2214_v33  ;;  %459 = vmatpush1.msra.mxu1 %v458_v28  ;;  %v470_v29 = vand.u32 4294901760, %v469_v26  ;;  %v2227_v46 = vand.u32 4294901760, %v2195_v39  ;;  %286 = vmatpush1.msra.mxu0 %v2150_v21  ;;  %v2236_v60 = vsub.f32 %v2080_v56, %v2113_v12  ;;  %v2239_v14 = vand.u32 4294901760, %v2205_v34  ;;  %v2252_v56 = vld [vmem:[#allocation5 + $0x8] sm:$0xff] }
  0x64   : > { %465 = vmatprep.subr.mxu1 %v464_v37  ;;  %v481_v28 = vsub.f32 %v2193_v63, %v3246_v27  ;;  %288 = vmatprep.subr.mxu0 %v2169_v7  ;;  %v476_v37 = vand.u32 4294901760, %v475_v44  ;;  %v2247_v27 = vsub.f32 %v2092_v61, %v2124_v43  ;;  %v2250_v26 = vand.u32 4294901760, %v2216_v53  ;;  %v2275_v44 = vld [vmem:[#allocation5] sm:$0xff] }
  0x65   : > { %3461 = vst [vmem:[#allocation27_spill] sm:$0xff] %v2227_v46  ;;  %3462 = vst [vmem:[#allocation28_spill] sm:$0xff] %v2236_v60  ;;  %471 = vmatpush1.msra.mxu1 %v470_v29  ;;  %290 = vmatpush1.msra.mxu0 %v2189_v62  ;;  %v3466_v50 = vand.u32 4294901760, %v2211_v55  ;;  %v2261_v1 = vsub.f32 %v2104_v2, %v2136_v52  ;;  %v3468_v61 = vand.u32 4294901760, %v2224_v58  ;;  %v2283_v41 = vand.u32 4294901760, %v2252_v56 }
  0x66   : > { %3463 = vst [vmem:[#allocation29_spill] sm:$0xff] %v2239_v14  ;;  %3464 = vst [vmem:[#allocation30_spill] sm:$0xff] %v2247_v27  ;;  %v482_v12 = vand.u32 4294901760, %v481_v28  ;;  %477 = vmatprep.subr.mxu1 %v476_v37  ;;  %292 = vmatprep.subr.mxu0 %v2203_v19  ;;  %v2269_v28 = vand.u32 4294901760, %v2241_v51  ;;  %v3471_v37 = vand.u32 4294901760, %v2236_v60 }
  0x67   : > { %3465 = vst [vmem:[#allocation31_spill] sm:$0xff] %v2250_v26  ;;  %v487_v29 = vsub.f32 %v2211_v55, %v3466_v50  ;;  %3467 = vst [vmem:[#allocation32_spill] sm:$0xff] %v2261_v1  ;;  %v493_v43 = vsub.f32 %v2224_v58, %v3468_v61  ;;  %v2273_v50 = vsub.f32 %v2115_v13, %v2150_v21  ;;  %294 = vmatpush1.msra.mxu0 %v2214_v33 }
  0x68   : > { %3469 = vst [vmem:[#allocation33_spill] sm:$0xff] %v2269_v28  ;;  %483 = vmatpush1.msra.mxu1 %v482_v12  ;;  %v499_v52 = vsub.f32 %v2236_v60, %v3471_v37  ;;  %3472 = vst [vmem:[#allocation35_spill] sm:$0xff] %v2283_v41  ;;  %296 = vmatprep.subr.mxu0 %v2227_v46  ;;  %v3473_v13 = vand.u32 4294901760, %v2247_v27  ;;  %v2294_v21 = vsub.f32 %v2138_v20, %v2169_v7  ;;  %v2296_v37 = vld [vmem:[#allocation5 + $0x1f0] sm:$0xff] }
  0x69   : > { %3470 = vst [vmem:[#allocation34_spill] sm:$0xff] %v2273_v50  ;;  %v488_v2 = vand.u32 4294901760, %v487_v29  ;;  %v494_v32 = vand.u32 4294901760, %v493_v43  ;;  %298 = vmatpush1.msra.mxu0 %v2239_v14  ;;  %v3475_v43 = vand.u32 4294901760, %v2261_v1  ;;  %v2303_v60 = vand.u32 4294901760, %v2275_v44  ;;  %v2309_v29 = vld [vmem:[#allocation5 + $0x1e8] sm:$0xff] }
  0x6a   : > { %v505_v12 = vsub.f32 %v2247_v27, %v3473_v13  ;;  %3474 = vst [vmem:[#allocation36_spill] sm:$0xff] %v2294_v21  ;;  %v500_v61 = vand.u32 4294901760, %v499_v52  ;;  %v2307_v13 = vsub.f32 %v2161_v38, %v2189_v62  ;;  %300 = vmatprep.subr.mxu0 %v2250_v26  ;;  %v3478_v52 = vand.u32 4294901760, %v2273_v50 }
  0x6b   : > { %489 = vmatprep.subr.mxu1 %v488_v2  ;;  %v511_v30 = vsub.f32 %v2261_v1, %v3475_v43  ;;  %3476 = vst [vmem:[#allocation37_spill] sm:$0xff] %v2303_v60  ;;  %v2317_v43 = vand.u32 4294901760, %v2285_v36  ;;  %v2319_v1 = vld [vmem:[#allocation5 + $0x1e0] sm:$0xff]  ;;  %302 = vmatpush1.msra.mxu0 %v2269_v28  ;;  %v2328_v62 = vand.u32 4294901760, %v2296_v37 }
  0x6c   : > { %3477 = vst [vmem:[#allocation38_spill] sm:$0xff] %v2307_v13  ;;  %495 = vmatpush1.msra.mxu1 %v494_v32  ;;  %v506_v20 = vand.u32 4294901760, %v505_v12  ;;  %v517_v2 = vsub.f32 %v2273_v50, %v3478_v52  ;;  %v2325_v12 = vsub.f32 %v2171_v47, %v2203_v19  ;;  %v2330_v52 = vld [vmem:[#allocation5 + $0x1d8] sm:$0xff]  ;;  %304 = vmatprep.subr.mxu0 %v2283_v41  ;;  %v2341_v47 = vand.u32 4294901760, %v2309_v29 }
  0x6d   : > { %3479 = vst [vmem:[#allocation39_spill] sm:$0xff] %v2317_v43  ;;  %501 = vmatprep.subr.mxu1 %v500_v61  ;;  %v512_v38 = vand.u32 4294901760, %v511_v30  ;;  %3481 = vst [vmem:[#allocation41_spill] sm:$0xff] %v2328_v62  ;;  %v3482_v61 = vand.u32 4294901760, %v2294_v21  ;;  %v2338_v32 = vsub.f32 %v2182_v49, %v2214_v33  ;;  %306 = vmatpush1.msra.mxu0 %v2303_v60  ;;  %v3485_v19 = vand.u32 4294901760, %v2307_v13  ;;  %v2355_v49 = vld [vmem:[#allocation5 + $0x1d0] sm:$0xff] }
  0x6e   : > { %3480 = vst [vmem:[#allocation40_spill] sm:$0xff] %v2325_v12  ;;  %507 = vmatpush1.msra.mxu1 %v506_v20  ;;  %v518_v7 = vand.u32 4294901760, %v517_v2  ;;  %3484 = vst [vmem:[#allocation43_spill] sm:$0xff] %v2341_v47  ;;  %v2350_v50 = vsub.f32 %v2195_v39, %v2227_v46  ;;  %308 = vmatprep.subr.mxu0 %v2317_v43  ;;  %v2364_v2 = vand.u32 4294901760, %v2330_v52  ;;  %v2366_v39 = vld [vmem:[#allocation5 + $0x1c8] sm:$0xff] }
  0x6f   : > { %v523_v30 = vsub.f32 %v2294_v21, %v3482_v61  ;;  %3483 = vst [vmem:[#allocation42_spill] sm:$0xff] %v2338_v32  ;;  %513 = vmatprep.subr.mxu1 %v512_v38  ;;  %v529_v20 = vsub.f32 %v2307_v13, %v3485_v19  ;;  %v2353_v61 = vand.u32 4294901760, %v2319_v1  ;;  %v3289_v38 = vand.u32 4294901760, %v2338_v32  ;;  %310 = vmatpush2.msra.mxu0 %v2328_v62 }
  0x70   : > { %3486 = vst [vmem:[#allocation44_spill] sm:$0xff] %v2350_v50  ;;  %519 = vmatpush1.msra.mxu1 %v518_v7  ;;  %v2361_v19 = vsub.f32 %v2205_v34, %v2239_v14  ;;  %3489 = vst [vmem:[#allocation47_spill] sm:$0xff] %v2364_v2  ;;  %v3490_v13 = vand.u32 4294901760, %v2325_v12  ;;  %312 = vmatprep.subr.mxu0 %v2341_v47  ;;  %v2383_v14 = vand.u32 4294901760, %v2355_v49  ;;  %v2389_v7 = vld [vmem:[#allocation5 + $0x1c0] sm:$0xff] }
  0x71   : > { %3487 = vst [vmem:[#allocation45_spill] sm:$0xff] %v2353_v61  ;;  %v524_v33 = vand.u32 4294901760, %v523_v30  ;;  %v530_v46 = vand.u32 4294901760, %v529_v20  ;;  %v2375_v30 = vsub.f32 %v2216_v53, %v2250_v26  ;;  %v541_v34 = vsub.f32 %v2338_v32, %v3289_v38  ;;  %314 = vmatpush2.msra.mxu0 %v2353_v61  ;;  %v2399_v32 = vld [vmem:[#allocation5 + $0x1b8] sm:$0xff] }
  0x72   : > { %3488 = vst [vmem:[#allocation46_spill] sm:$0xff] %v2361_v19  ;;  %v535_v21 = vsub.f32 %v2325_v12, %v3490_v13  ;;  %3492 = vst [vmem:[#allocation49_spill] sm:$0xff] %v2383_v14  ;;  %v2387_v13 = vsub.f32 %v2241_v51, %v2269_v28  ;;  %v2397_v20 = vand.u32 4294901760, %v2366_v39  ;;  %v3496_v51 = vand.u32 4294901760, %v2361_v19  ;;  %316 = vmatprep.subr.mxu0 %v2364_v2 }
  0x73   : > { %3491 = vst [vmem:[#allocation48_spill] sm:$0xff] %v2375_v30  ;;  %525 = vmatprep.subr.mxu1 %v524_v33  ;;  %v3494_v33 = vand.u32 4294901760, %v2350_v50  ;;  %v542_v12 = vand.u32 4294901760, %v541_v34  ;;  %318 = vmatpush2.msra.mxu0 %v2383_v14 }
  0x74   : > { %3493 = vst [vmem:[#allocation50_spill] sm:$0xff] %v2387_v13  ;;  %531 = vmatpush1.msra.mxu1 %v530_v46  ;;  %v536_v53 = vand.u32 4294901760, %v535_v21  ;;  %3495 = vst [vmem:[#allocation51_spill] sm:$0xff] %v2397_v20  ;;  %v553_v28 = vsub.f32 %v2361_v19, %v3496_v51  ;;  %v2408_v46 = vsub.f32 %v2252_v56, %v2283_v41  ;;  %v2417_v51 = vand.u32 4294901760, %v2389_v7  ;;  %v2423_v19 = vld [vmem:[#allocation5 + $0x1a8] sm:$0xff] }
  0x75   : > { %v547_v26 = vsub.f32 %v2350_v50, %v3494_v33  ;;  %v2410_v33 = vld [vmem:[#allocation5 + $0x1b0] sm:$0xff]  ;;  %v3498_v50 = vand.u32 4294901760, %v2375_v30  ;;  %v2421_v21 = vsub.f32 %v2275_v44, %v2303_v60  ;;  %320 = vmatprep.subr.mxu0 %v2397_v20  ;;  %v2431_v41 = vand.u32 4294901760, %v2399_v32  ;;  %v2444_v60 = vld [vmem:[#allocation5 + $0x198] sm:$0xff] }
  0x76   : > { %3497 = vst [vmem:[#allocation52_spill] sm:$0xff] %v2408_v46  ;;  %537 = vmatprep.subr.mxu1 %v536_v53  ;;  %3499 = vst [vmem:[#allocation53_spill] sm:$0xff] %v2417_v51  ;;  %v554_v56 = vand.u32 4294901760, %v553_v28  ;;  %v3501_v53 = vand.u32 4294901760, %v2387_v13  ;;  %322 = vmatpush2.msra.mxu0 %v2417_v51  ;;  %v2439_v28 = vsub.f32 %v2285_v36, %v2317_v43  ;;  %v2455_v36 = vand.u32 4294901760, %v2423_v19 }
  0x77   : > { %v548_v38 = vand.u32 4294901760, %v547_v26  ;;  %v559_v34 = vsub.f32 %v2375_v30, %v3498_v50  ;;  %3500 = vst [vmem:[#allocation54_spill] sm:$0xff] %v2421_v21  ;;  %543 = vmatpush1.msra.mxu1 %v542_v12  ;;  %3502 = vst [vmem:[#allocation55_spill] sm:$0xff] %v2431_v41  ;;  %v2433_v30 = vld [vmem:[#allocation5 + $0x1a0] sm:$0xff]  ;;  %v3312_v12 = vand.u32 4294901760, %v2421_v21  ;;  %324 = vmatprep.subr.mxu0 %v2431_v41 }
  0x78   : > { %v565_v26 = vsub.f32 %v2387_v13, %v3501_v53  ;;  %3503 = vst [vmem:[#allocation56_spill] sm:$0xff] %v2439_v28  ;;  %v2442_v53 = vand.u32 4294901760, %v2410_v33  ;;  %v3505_v13 = vand.u32 4294901760, %v2408_v46  ;;  %3507 = vst [vmem:[#allocation59_spill] sm:$0xff] %v2455_v36 }
  0x79   : > { %549 = vmatprep.subr.mxu1 %v548_v38  ;;  %v560_v44 = vand.u32 4294901760, %v559_v34  ;;  %v2452_v34 = vsub.f32 %v2296_v37, %v2328_v62  ;;  %v577_v43 = vsub.f32 %v2421_v21, %v3312_v12  ;;  %v2469_v37 = vld [vmem:[#allocation5 + $0x190] sm:$0xff]  ;;  %v2475_v12 = vsub.f32 %v2319_v1, %v2353_v61 }
  0x7a   : > { %3504 = vst [vmem:[#allocation57_spill] sm:$0xff] %v2442_v53  ;;  %555 = vmatpush1.msra.mxu1 %v554_v56  ;;  %v566_v50 = vand.u32 4294901760, %v565_v26  ;;  %v571_v38 = vsub.f32 %v2408_v46, %v3505_v13  ;;  %326 = vmatpush2.msra.mxu0 %v2442_v53  ;;  %v2464_v13 = vsub.f32 %v2309_v29, %v2341_v47  ;;  %v2467_v26 = vand.u32 4294901760, %v2433_v30  ;;  %v2480_v29 = vld [vmem:[#allocation5 + $0x188] sm:$0xff] }
  0x7b   : > { %3506 = vst [vmem:[#allocation58_spill] sm:$0xff] %v2452_v34  ;;  %561 = vmatprep.subr.mxu1 %v560_v44  ;;  %v3323_v44 = vand.u32 4294901760, %v2452_v34  ;;  %328 = vmatprep.subr.mxu0 %v2455_v36  ;;  %3510 = vst [vmem:[#allocation62_spill] sm:$0xff] %v2475_v12  ;;  %v2478_v56 = vand.u32 4294901760, %v2444_v60  ;;  %v578_v47 = vand.u32 4294901760, %v577_v43  ;;  %v3512_v21 = vand.u32 4294901760, %v2439_v28 }
  0x7c   : > { %3508 = vst [vmem:[#allocation60_spill] sm:$0xff] %v2464_v13  ;;  %3509 = vst [vmem:[#allocation61_spill] sm:$0xff] %v2467_v26  ;;  %567 = vmatpush1.msra.mxu1 %v566_v50  ;;  %v572_v62 = vand.u32 4294901760, %v571_v38  ;;  %330 = vmatpush2.msra.mxu0 %v2467_v26  ;;  %v2489_v38 = vsub.f32 %v2330_v52, %v2364_v2  ;;  %v2497_v43 = vand.u32 4294901760, %v2469_v37  ;;  %v2503_v50 = vld [vmem:[#allocation5 + $0x180] sm:$0xff]  ;;  %v2510_v61 = vand.u32 4294901760, %v2480_v29 }
  0x7d   : > { %3511 = vst [vmem:[#allocation63_spill] sm:$0xff] %v2478_v56  ;;  %v583_v46 = vsub.f32 %v2439_v28, %v3512_v21  ;;  %v589_v1 = vsub.f32 %v2452_v34, %v3323_v44  ;;  %332 = vmatprep.subr.mxu0 %v2478_v56  ;;  %v2501_v21 = vsub.f32 %v2355_v49, %v2383_v14  ;;  %v2512_v34 = vld [vmem:[#allocation5 + $0x178] sm:$0xff]  ;;  %v3518_v27 = vand.u32 4294901760, %v2475_v12 }
  0x7e   : > { %3513 = vst [vmem:[#allocation64_spill] sm:$0xff] %v2489_v38  ;;  %573 = vmatprep.subr.mxu1 %v572_v62  ;;  %3514 = vst [vmem:[#allocation65_spill] sm:$0xff] %v2497_v43  ;;  %v3516_v62 = vand.u32 4294901760, %v2464_v13  ;;  %334 = vmatpush2.msra.mxu0 %v2497_v43  ;;  %v3520_v14 = vand.u32 4294901760, %v2489_v38 }
  0x7f   : > { %3515 = vst [vmem:[#allocation66_spill] sm:$0xff] %v2501_v21  ;;  %579 = vmatpush1.msra.mxu1 %v578_v47  ;;  %v584_v52 = vand.u32 4294901760, %v583_v46  ;;  %3517 = vst [vmem:[#allocation67_spill] sm:$0xff] %v2510_v61  ;;  %v590_v28 = vand.u32 4294901760, %v589_v1  ;;  %v601_v49 = vsub.f32 %v2475_v12, %v3518_v27  ;;  %v2521_v46 = vsub.f32 %v2366_v39, %v2397_v20  ;;  %v2536_v12 = vld [vmem:[#allocation5 + $0x168] sm:$0xff] }
  0x80   : > { %v595_v2 = vsub.f32 %v2464_v13, %v3516_v62  ;;  %v2523_v62 = vld [vmem:[#allocation5 + $0x170] sm:$0xff]  ;;  %v607_v1 = vsub.f32 %v2489_v38, %v3520_v14  ;;  %336 = vmatprep.subr.mxu0 %v2510_v61  ;;  %v2530_v27 = vand.u32 4294901760, %v2503_v50  ;;  %v2534_v47 = vsub.f32 %v2389_v7, %v2417_v51  ;;  %v2545_v38 = vld [vmem:[#allocation5 + $0x160] sm:$0xff] }
  0x81   : > { %3519 = vst [vmem:[#allocation68_spill] sm:$0xff] %v2521_v46  ;;  %585 = vmatprep.subr.mxu1 %v584_v52  ;;  %v602_v39 = vand.u32 4294901760, %v601_v49  ;;  %v3523_v52 = vand.u32 4294901760, %v2501_v21  ;;  %v2543_v14 = vand.u32 4294901760, %v2512_v34  ;;  %v2554_v49 = vand.u32 4294901760, %v2523_v62 }
  0x82   : > { %v596_v44 = vand.u32 4294901760, %v595_v2  ;;  %3521 = vst [vmem:[#allocation69_spill] sm:$0xff] %v2530_v27  ;;  %3522 = vst [vmem:[#allocation70_spill] sm:$0xff] %v2534_v47  ;;  %591 = vmatpush2.msra.mxu1 %v590_v28  ;;  %v608_v13 = vand.u32 4294901760, %v607_v1  ;;  %338 = vmatpush2.msra.mxu0 %v2530_v27  ;;  %v3346_v7 = vand.u32 4294901760, %v2534_v47  ;;  %v2551_v28 = vsub.f32 %v2399_v32, %v2431_v41 }
  0x83   : > { %v613_v2 = vsub.f32 %v2501_v21, %v3523_v52  ;;  %3524 = vst [vmem:[#allocation71_spill] sm:$0xff] %v2543_v14  ;;  %3526 = vst [vmem:[#allocation73_spill] sm:$0xff] %v2554_v49  ;;  %v2556_v52 = vld [vmem:[#allocation5 + $0x158] sm:$0xff]  ;;  %v3527_v51 = vand.u32 4294901760, %v2521_v46  ;;  %340 = vmatprep.subr.mxu0 %v2543_v14  ;;  %v2564_v1 = vsub.f32 %v2410_v33, %v2442_v53  ;;  %v2567_v32 = vand.u32 4294901760, %v2536_v12  ;;  %v2581_v33 = vld [vmem:[#allocation5 + $0x150] sm:$0xff] }
  0x84   : > { %597 = vmatprep.subr.mxu1 %v596_v44  ;;  %3525 = vst [vmem:[#allocation72_spill] sm:$0xff] %v2551_v28  ;;  %v625_v41 = vsub.f32 %v2534_v47, %v3346_v7  ;;  %342 = vmatpush2.msra.mxu0 %v2554_v49  ;;  %v2587_v7 = vsub.f32 %v2433_v30, %v2467_v26  ;;  %v3534_v47 = vand.u32 4294901760, %v2551_v28 }
  0x85   : > { %603 = vmatpush2.msra.mxu1 %v602_v39  ;;  %v614_v20 = vand.u32 4294901760, %v613_v2  ;;  %v619_v44 = vsub.f32 %v2521_v46, %v3527_v51  ;;  %3528 = vst [vmem:[#allocation74_spill] sm:$0xff] %v2564_v1  ;;  %3529 = vst [vmem:[#allocation75_spill] sm:$0xff] %v2567_v32  ;;  %v2576_v51 = vsub.f32 %v2423_v19, %v2455_v36  ;;  %v2579_v2 = vand.u32 4294901760, %v2545_v38  ;;  %v2592_v19 = vld [vmem:[#allocation5 + $0x148] sm:$0xff] }
  0x86   : > { %609 = vmatprep.subr.mxu1 %v608_v13  ;;  %v3357_v13 = vand.u32 4294901760, %v2564_v1  ;;  %344 = vmatprep.subr.mxu0 %v2567_v32  ;;  %3532 = vst [vmem:[#allocation78_spill] sm:$0xff] %v2587_v7  ;;  %v2590_v39 = vand.u32 4294901760, %v2556_v52  ;;  %v626_v36 = vand.u32 4294901760, %v625_v41  ;;  %v631_v46 = vsub.f32 %v2551_v28, %v3534_v47 }
  0x87   : > { %3530 = vst [vmem:[#allocation76_spill] sm:$0xff] %v2576_v51  ;;  %3531 = vst [vmem:[#allocation77_spill] sm:$0xff] %v2579_v2  ;;  %615 = vmatpush2.msra.mxu1 %v614_v20  ;;  %v620_v53 = vand.u32 4294901760, %v619_v44  ;;  %346 = vmatpush2.msra.mxu0 %v2579_v2  ;;  %v2601_v44 = vsub.f32 %v2444_v60, %v2478_v56  ;;  %v2609_v41 = vand.u32 4294901760, %v2581_v33  ;;  %v2615_v20 = vld [vmem:[#allocation5 + $0x140] sm:$0xff]  ;;  %v2622_v26 = vand.u32 4294901760, %v2592_v19 }
  0x88   : > { %3533 = vst [vmem:[#allocation79_spill] sm:$0xff] %v2590_v39  ;;  %v637_v30 = vsub.f32 %v2564_v1, %v3357_v13  ;;  %348 = vmatprep.subr.mxu0 %v2590_v39  ;;  %v2613_v47 = vsub.f32 %v2469_v37, %v2497_v43  ;;  %v632_v60 = vand.u32 4294901760, %v631_v46  ;;  %v2624_v1 = vld [vmem:[#allocation5 + $0x138] sm:$0xff]  ;;  %v3540_v21 = vand.u32 4294901760, %v2587_v7 }
  0x89   : > { %3535 = vst [vmem:[#allocation80_spill] sm:$0xff] %v2601_v44  ;;  %621 = vmatprep.subr.mxu1 %v620_v53  ;;  %3536 = vst [vmem:[#allocation81_spill] sm:$0xff] %v2609_v41  ;;  %v3538_v53 = vand.u32 4294901760, %v2576_v51  ;;  %350 = vmatpush2.msra.mxu0 %v2609_v41  ;;  %v2633_v46 = vsub.f32 %v2480_v29, %v2510_v61  ;;  %v3542_v43 = vand.u32 4294901760, %v2601_v44 }
  0x8a   : > { %3537 = vst [vmem:[#allocation82_spill] sm:$0xff] %v2613_v47  ;;  %627 = vmatpush2.msra.mxu1 %v626_v36  ;;  %3539 = vst [vmem:[#allocation83_spill] sm:$0xff] %v2622_v26  ;;  %v638_v28 = vand.u32 4294901760, %v637_v30  ;;  %v649_v37 = vsub.f32 %v2587_v7, %v3540_v21  ;;  %352 = vmatprep.subr.mxu0 %v2622_v26  ;;  %v2642_v21 = vand.u32 4294901760, %v2615_v20  ;;  %v2648_v7 = vld [vmem:[#allocation5 + $0x128] sm:$0xff] }
  0x8b   : > { %v643_v56 = vsub.f32 %v2576_v51, %v3538_v53  ;;  %3541 = vst [vmem:[#allocation84_spill] sm:$0xff] %v2633_v46  ;;  %v2635_v53 = vld [vmem:[#allocation5 + $0x130] sm:$0xff]  ;;  %633 = vmatprep.subr.mxu1 %v632_v60  ;;  %v655_v30 = vsub.f32 %v2601_v44, %v3542_v43  ;;  %v2646_v36 = vsub.f32 %v2503_v50, %v2530_v27  ;;  %v3545_v60 = vand.u32 4294901760, %v2613_v47  ;;  %v2657_v44 = vld [vmem:[#allocation5 + $0x120] sm:$0xff] }
  0x8c   : > { %3543 = vst [vmem:[#allocation85_spill] sm:$0xff] %v2642_v21  ;;  %639 = vmatpush2.msra.mxu1 %v638_v28  ;;  %v650_v29 = vand.u32 4294901760, %v649_v37  ;;  %v2655_v43 = vand.u32 4294901760, %v2624_v1  ;;  %354 = vmatpush2.msra.mxu0 %v2642_v21  ;;  %v2663_v28 = vsub.f32 %v2512_v34, %v2543_v14  ;;  %v2666_v37 = vand.u32 4294901760, %v2635_v53 }
  0x8d   : > { %v644_v13 = vand.u32 4294901760, %v643_v56  ;;  %3544 = vst [vmem:[#allocation86_spill] sm:$0xff] %v2646_v36  ;;  %v661_v56 = vsub.f32 %v2613_v47, %v3545_v60  ;;  %v656_v51 = vand.u32 4294901760, %v655_v30  ;;  %v3380_v50 = vand.u32 4294901760, %v2646_v36  ;;  %v2668_v60 = vld [vmem:[#allocation5 + $0x118] sm:$0xff] }
  0x8e   : > { %3546 = vst [vmem:[#allocation87_spill] sm:$0xff] %v2655_v43  ;;  %3547 = vst [vmem:[#allocation88_spill] sm:$0xff] %v2663_v28  ;;  %v3548_v27 = vand.u32 4294901760, %v2633_v46  ;;  %356 = vmatprep.subr.mxu0 %v2655_v43  ;;  %v2676_v30 = vsub.f32 %v2523_v62, %v2554_v49  ;;  %v2679_v34 = vand.u32 4294901760, %v2648_v7  ;;  %v2693_v62 = vld [vmem:[#allocation5 + $0x110] sm:$0xff] }
  0x8f   : > { %645 = vmatprep.subr.mxu1 %v644_v13  ;;  %v662_v61 = vand.u32 4294901760, %v661_v56  ;;  %v673_v14 = vsub.f32 %v2646_v36, %v3380_v50  ;;  %358 = vmatpush2.msra.mxu0 %v2666_v37  ;;  %v2691_v56 = vand.u32 4294901760, %v2657_v44  ;;  %v2699_v50 = vsub.f32 %v2545_v38, %v2579_v2  ;;  %v2727_v2 = vld [vmem:[#allocation5 + $0x100] sm:$0xff] }
  0x90   : > { %651 = vmatpush2.msra.mxu1 %v650_v29  ;;  %v667_v13 = vsub.f32 %v2633_v46, %v3548_v27  ;;  %3549 = vst [vmem:[#allocation89_spill] sm:$0xff] %v2676_v30  ;;  %3550 = vst [vmem:[#allocation90_spill] sm:$0xff] %v2679_v34  ;;  %v2688_v27 = vsub.f32 %v2536_v12, %v2567_v32  ;;  %360 = vmatprep.subr.mxu0 %v2679_v34  ;;  %v2702_v29 = vand.u32 4294901760, %v2668_v60  ;;  %v2704_v12 = vld [vmem:[#allocation5 + $0x108] sm:$0xff] }
  0x91   : > { %657 = vmatprep.subr.mxu1 %v656_v51  ;;  %3551 = vst [vmem:[#allocation91_spill] sm:$0xff] %v2691_v56  ;;  %v3391_v51 = vand.u32 4294901760, %v2676_v30  ;;  %3552 = vst [vmem:[#allocation92_spill] sm:$0xff] %v2699_v50  ;;  %v674_v32 = vand.u32 4294901760, %v673_v14  ;;  %v3554_v36 = vand.u32 4294901760, %v2663_v28  ;;  %362 = vmatpush2.msra.mxu0 %v2691_v56  ;;  %v2734_v14 = vand.u32 4294901760, %v2704_v12 }
  0x92   : > { %663 = vmatpush2.msra.mxu1 %v662_v61  ;;  %v668_v49 = vand.u32 4294901760, %v667_v13  ;;  %3553 = vst [vmem:[#allocation93_spill] sm:$0xff] %v2702_v29  ;;  %v2713_v13 = vsub.f32 %v2556_v52, %v2590_v39  ;;  %364 = vmatprep.subr.mxu0 %v2702_v29  ;;  %v2725_v61 = vsub.f32 %v2581_v33, %v2609_v41  ;;  %v3558_v47 = vand.u32 4294901760, %v2699_v50 }
  0x93   : > { %v679_v46 = vsub.f32 %v2663_v28, %v3554_v36  ;;  %v685_v38 = vsub.f32 %v2676_v30, %v3391_v51  ;;  %v2721_v36 = vand.u32 4294901760, %v2693_v62  ;;  %v175_v30 = vld [vmem:[%s1962_s22] sm:$0xff] }
  0x94   : > { %3555 = vst [vmem:[#allocation94_spill] sm:$0xff] %v2713_v13  ;;  %669 = vmatprep.subr.mxu1 %v668_v49  ;;  %v3557_v49 = vand.u32 4294901760, %v2688_v27  ;;  %v3402_v51 = vand.u32 4294901760, %v2713_v13  ;;  %v697_v33 = vsub.f32 %v2699_v50, %v3558_v47  ;;  %v2755_v47 = vsub.f32 %v2615_v20, %v2642_v21 }
  0x95   : > { %3556 = vst [vmem:[#allocation95_spill] sm:$0xff] %v2721_v36  ;;  %675 = vmatpush2.msra.mxu1 %v674_v32  ;;  %v680_v52 = vand.u32 4294901760, %v679_v46  ;;  %v686_v28 = vand.u32 4294901760, %v685_v38  ;;  %366 = vmatpush2.msra.mxu0 %v2721_v36  ;;  %v2744_v46 = vsub.f32 %v2592_v19, %v2622_v26  ;;  %v2751_v38 = vand.u32 4294901760, %v2727_v2 }
  0x96   : > { %v691_v39 = vsub.f32 %v2688_v27, %v3557_v49  ;;  %v703_v41 = vsub.f32 %v2713_v13, %v3402_v51  ;;  %368 = vmatprep.subr.mxu0 %v2734_v14  ;;  %v698_v32 = vand.u32 4294901760, %v697_v33  ;;  %v3559_v19 = vand.u32 4294901760, %v2725_v61 }
  0x97   : > { %681 = vmatprep.subr.mxu1 %v680_v52  ;;  %v241_v26 = vcombine.high %v175_v30, %v175_v30  ;;  %370 = vmatpush2.msra.mxu0 %v2751_v38  ;;  %v3409_v13 = vand.u32 4294901760, %v2755_v47  ;;  %v2763_v50 = vand.u32 4294901760, %v175_v30  ;;  %v2767_v20 = vsub.f32 %v2624_v1, %v2655_v43 }
  0x98   : > { %v692_v49 = vand.u32 4294901760, %v691_v39  ;;  %687 = vmatpush2.msra.mxu1 %v686_v28  ;;  %v709_v52 = vsub.f32 %v2725_v61, %v3559_v19  ;;  %v3407_v39 = vand.u32 4294901760, %v2744_v46  ;;  %v704_v51 = vand.u32 4294901760, %v703_v41  ;;  %783 = vmatprep.subr.mxu0 %v1992_v18 }
  0x99   : > { %3560 = vst [vmem:[#allocation96_spill] sm:$0xff] %v2763_v50  ;;  %v2772_v19 = vand.u32 4294901760, %v241_v26  ;;  %v2777_v41 = vsub.f32 %v2635_v53, %v2666_v37  ;;  %v721_v1 = vsub.f32 %v2755_v47, %v3409_v13 }
  0x9a   : > { %693 = vmatprep.subr.mxu1 %v692_v49  ;;  %v710_v28 = vand.u32 4294901760, %v709_v52  ;;  %v715_v33 = vsub.f32 %v2744_v46, %v3407_v39  ;;  %v2784_v49 = vsub.f32 %v175_v30, %v2763_v50  ;;  %v2788_v52 = vsub.f32 %v2648_v7, %v2679_v34 }
  0x9b   : > { %699 = vmatpush2.msra.mxu1 %v698_v32  ;;  %3561 = vst [vmem:[#allocation97_spill] sm:$0xff] %v2772_v19  ;;  %v3412_v32 = vand.u32 4294901760, %v2767_v20  ;;  %v2791_v18 = vsub.f32 %v241_v26, %v2772_v19  ;;  %v3413_v53 = vand.u32 4294901760, %v2777_v41  ;;  %773 = vmatprep.mubr.f32.mxu1 %v2772_v19  ;;  %v722_v13 = vand.u32 4294901760, %v721_v1 }
  0x9c   : > { %705 = vmatprep.subr.mxu1 %v704_v51  ;;  %v716_v39 = vand.u32 4294901760, %v715_v33  ;;  %v2796_v51 = vsub.f32 %v2657_v44, %v2691_v56  ;;  %v3416_v7 = vand.u32 4294901760, %v2784_v49  ;;  %v2811_v1 = vsub.f32 %v2668_v60, %v2702_v29 }
  0x9d   : > { %711 = vmatpush2.msra.mxu1 %v710_v28  ;;  %v727_v30 = vsub.f32 %v2767_v20, %v3412_v32  ;;  %v3419_v28 = vand.u32 4294901760, %v2788_v52  ;;  %v733_v33 = vsub.f32 %v2777_v41, %v3413_v53  ;;  %v2821_v26 = vsub.f32 %v2693_v62, %v2721_v36 }
  0x9e   : > { %717 = vmatprep.subr.mxu1 %v716_v39  ;;  %v380_v32 = vsub.f32 %v2784_v49, %v3416_v7  ;;  %v3563_v53 = vand.u32 4294901760, %v2791_v18  ;;  %v3427_v29 = vand.u32 4294901760, %v2811_v1  ;;  %v2833_v62 = vsub.f32 %v2704_v12, %v2734_v14 }
  0x9f   : > { %723 = vmatpush2.msra.mxu1 %v722_v13  ;;  %v728_v19 = vand.u32 4294901760, %v727_v30  ;;  %v739_v39 = vsub.f32 %v2788_v52, %v3419_v28  ;;  %3562 = vst [vmem:[#allocation98_spill] sm:$0xff] %v2821_v26  ;;  %v734_v60 = vand.u32 4294901760, %v733_v33  ;;  %v3564_v13 = vand.u32 4294901760, %v2796_v51 }
  0xa0   : > { %v374_v44 = vsub.f32 %v2791_v18, %v3563_v53  ;;  %v381_v7 = vand.u32 4294901760, %v380_v32  ;;  %v3426_v28 = vand.u32 4294901760, %v2821_v26  ;;  %v751_v53 = vsub.f32 %v2811_v1, %v3427_v29  ;;  %v3581_v29 = vld [vmem:[#allocation19_spill] sm:$0xff] }
  0xa1   : > { %v745_v30 = vsub.f32 %v2796_v51, %v3564_v13  ;;  %729 = vmatprep.subr.mxu1 %v728_v19  ;;  %v740_v56 = vand.u32 4294901760, %v739_v39  ;;  %v2840_v33 = vsub.f32 %v2727_v2, %v2751_v38  ;;  %v3425_v32 = vand.u32 4294901760, %v2833_v62  ;;  %v3568_v13 = vld [vmem:[#allocation30_spill] sm:$0xff] }
  0xa2   : > { %v375_v36 = vand.u32 4294901760, %v374_v44  ;;  %735 = vmatpush2.msra.mxu1 %v734_v60  ;;  %v757_v19 = vsub.f32 %v2821_v26, %v3426_v28  ;;  %v752_v12 = vand.u32 4294901760, %v751_v53  ;;  %v3570_v53 = vld [vmem:[#allocation32_spill] sm:$0xff]  ;;  %v3580_v28 = vld [vmem:[#allocation42_spill] sm:$0xff] }
  0xa3   : > { %v746_v34 = vand.u32 4294901760, %v745_v30  ;;  %3565 = vst [vmem:[#allocation99_spill] sm:$0xff] %v2840_v33  ;;  %741 = vmatprep.subr.mxu1 %v740_v56  ;;  %v3424_v44 = vand.u32 4294901760, %v2840_v33  ;;  %v763_v60 = vsub.f32 %v2833_v62, %v3425_v32  ;;  %v3569_v30 = vld [vmem:[#allocation13_spill] sm:$0xff]  ;;  %v3579_v32 = vld [vmem:[#allocation18_spill] sm:$0xff] }
  0xa4   : > { %376 = vmatprep.mubr.f32.mxu0 %v375_v36  ;;  %v758_v39 = vand.u32 4294901760, %v757_v19  ;;  %v3566_v36 = vld [vmem:[#allocation28_spill] sm:$0xff]  ;;  %v3571_v19 = vld [vmem:[#allocation14_spill] sm:$0xff] }
  0xa5   : > { %747 = vmatpush2.msra.mxu1 %v746_v34  ;;  %382 = vmatmul.mubr.f32.vlgmr.msra.gmra.mxu0 %v381_v7  ;;  %v769_v2 = vsub.f32 %v2840_v33, %v3424_v44  ;;  %v764_v34 = vand.u32 4294901760, %v763_v60  ;;  %v3567_v7 = vld [vmem:[#allocation12_spill] sm:$0xff] }
  0xa6   : > { %786 = vmatpush1.msra.mxu0 %v2005_v23  ;;  %753 = vmatprep.subr.mxu1 %v752_v12  ;;  %v3572_v12 = vld [vmem:[#allocation34_spill] sm:$0xff]  ;;  %v3574_v60 = vld [vmem:[#allocation36_spill] sm:$0xff] }
  0xa7   : > { %789 = vmatprep.subr.mxu0 %v2011_v25  ;;  %759 = vmatpush2.msra.mxu1 %v758_v39  ;;  %v770_v56 = vand.u32 4294901760, %v769_v2  ;;  %v3573_v39 = vld [vmem:[#allocation15_spill] sm:$0xff]  ;;  %v3575_v2 = vld [vmem:[#allocation16_spill] sm:$0xff] }
  0xa8   : > { %792 = vmatpush1.msra.mxu0 %v2025_v31  ;;  %975 = vmatprep.mubr.f32.mxu0 %v2791_v18  ;;  %v3578_v44 = vld [vmem:[#allocation40_spill] sm:$0xff] }
  0xa9   : > { %795 = vmatprep.subr.mxu0 %v2034_v35  ;;  %765 = vmatprep.subr.mxu1 %v764_v34  ;;  %v3576_v34 = vld [vmem:[#allocation38_spill] sm:$0xff] }
  0xaa   : > { %798 = vmatpush1.msra.mxu0 %v2047_v40  ;;  %771 = vmatpush2.msra.mxu1 %v770_v56  ;;  %v3577_v56 = vld [vmem:[#allocation17_spill] sm:$0xff] }
  0xab   : > { %801 = vmatprep.subr.mxu0 %v2061_v45  ;;  %775 = vmatmul.mubr.f32.vlgmr.msra.gmra.mxu1 %v2763_v50  ;;  %v3582_v50 = vld [vmem:[#allocation44_spill] sm:$0xff] }
  0xac   : > { %804 = vmatpush1.msra.mxu0 %v2087_v59  ;;  %985 = vmatprep.subr.mxu1 %v1972_v3 }
  0xad   : > { %807 = vmatprep.subr.mxu0 %v2099_v0  ;;  %987 = vmatpush1.msra.mxu1 %v1974_v4 }
  0xae   : > { %810 = vmatpush1.msra.mxu0 %v2110_v8  ;;  %989 = vmatprep.subr.mxu1 %v1976_v5 }
  0xaf   : > { %813 = vmatprep.subr.mxu0 %v2121_v42  ;;  %991 = vmatpush1.msra.mxu1 %v1978_v9 }
  0xb0   : > { %816 = vmatpush1.msra.mxu0 %v2133_v48  ;;  %993 = vmatprep.subr.mxu1 %v1980_v10 }
  0xb1   : > { %819 = vmatprep.subr.mxu0 %v2147_v57  ;;  %995 = vmatpush1.msra.mxu1 %v1982_v11 }
  0xb2   : > { %822 = vmatpush1.msra.mxu0 %v2159_v6  ;;  %997 = vmatprep.subr.mxu1 %v1985_v15 }
  0xb3   : > { %825 = vmatprep.subr.mxu0 %v2180_v54  ;;  %999 = vmatpush1.msra.mxu1 %v1987_v16 }
  0xb4   : > { %828 = vmatpush1.msra.mxu0 %v2193_v63  ;;  %1001 = vmatprep.subr.mxu1 %v1989_v17 }
  0xb5   : > { %831 = vmatprep.subr.mxu0 %v2211_v55  ;;  %1003 = vmatpush1.msra.mxu1 %v2002_v22 }
  0xb6   : > { %834 = vmatpush1.msra.mxu0 %v2224_v58  ;;  %1005 = vmatprep.subr.mxu1 %v2008_v24 }
  0xb7   : > { %837 = vmatprep.subr.mxu0 %v3566_v36  ;;  %1007 = vmatpush1.msra.mxu1 %v3567_v7 }
  0xb8   : > { %840 = vmatpush1.msra.mxu0 %v3568_v13  ;;  %1009 = vmatprep.subr.mxu1 %v3569_v30 }
  0xb9   : > { %843 = vmatprep.subr.mxu0 %v3570_v53  ;;  %1011 = vmatpush1.msra.mxu1 %v3571_v19  ;;  %v3583_v19 = vld [vmem:[#allocation20_spill] sm:$0xff] }
  0xba   : > { %846 = vmatpush1.msra.mxu0 %v3572_v12  ;;  %1013 = vmatprep.subr.mxu1 %v3573_v39  ;;  %v3584_v39 = vld [vmem:[#allocation46_spill] sm:$0xff] }
  0xbb   : > { %849 = vmatprep.subr.mxu0 %v3574_v60  ;;  %1015 = vmatpush1.msra.mxu1 %v3575_v2  ;;  %v3585_v60 = vld [vmem:[#allocation21_spill] sm:$0xff]  ;;  %v3586_v2 = vld [vmem:[#allocation48_spill] sm:$0xff] }
  0xbc   : > { %852 = vmatpush1.msra.mxu0 %v3576_v34  ;;  %1017 = vmatprep.subr.mxu1 %v3577_v56  ;;  %v3587_v34 = vld [vmem:[#allocation22_spill] sm:$0xff] }
  0xbd   : > { %855 = vmatprep.subr.mxu0 %v3578_v44  ;;  %1019 = vmatpush1.msra.mxu1 %v3579_v32  ;;  %v3588_v56 = vld [vmem:[#allocation50_spill] sm:$0xff]  ;;  %v3589_v44 = vld [vmem:[#allocation23_spill] sm:$0xff]  ;;  %v3590_v32 = vld [vmem:[#allocation52_spill] sm:$0xff] }
  0xbe   : > { %858 = vmatpush1.msra.mxu0 %v3580_v28  ;;  %1021 = vmatprep.subr.mxu1 %v3581_v29  ;;  %v3591_v28 = vld [vmem:[#allocation24_spill] sm:$0xff]  ;;  %v3592_v29 = vld [vmem:[#allocation54_spill] sm:$0xff] }
  0xbf   : > { %861 = vmatprep.subr.mxu0 %v3582_v50  ;;  %1023 = vmatpush1.msra.mxu1 %v3583_v19  ;;  %v3593_v50 = vld [vmem:[#allocation25_spill] sm:$0xff]  ;;  %v3594_v19 = vld [vmem:[#allocation56_spill] sm:$0xff] }
  0xc0   : > { %864 = vmatpush1.msra.mxu0 %v3584_v39  ;;  %1025 = vmatprep.subr.mxu1 %v3585_v60  ;;  %v3595_v39 = vld [vmem:[#allocation26_spill] sm:$0xff] }
  0xc1   : > { %867 = vmatprep.subr.mxu0 %v3586_v2  ;;  %1027 = vmatpush1.msra.mxu1 %v3587_v34  ;;  %v3596_v60 = vld [vmem:[#allocation58_spill] sm:$0xff]  ;;  %v3597_v2 = vld [vmem:[#allocation27_spill] sm:$0xff]  ;;  %v3598_v34 = vld [vmem:[#allocation60_spill] sm:$0xff] }
  0xc2   : > { %870 = vmatpush1.msra.mxu0 %v3588_v56  ;;  %1029 = vmatprep.subr.mxu1 %v3589_v44  ;;  %v3599_v56 = vld [vmem:[#allocation29_spill] sm:$0xff]  ;;  %v3600_v44 = vld [vmem:[#allocation62_spill] sm:$0xff] }
  0xc3   : > { %873 = vmatprep.subr.mxu0 %v3590_v32  ;;  %1031 = vmatpush1.msra.mxu1 %v3591_v28  ;;  %v3601_v32 = vld [vmem:[#allocation31_spill] sm:$0xff]  ;;  %v3602_v28 = vld [vmem:[#allocation64_spill] sm:$0xff] }
  0xc4   : > { %876 = vmatpush1.msra.mxu0 %v3592_v29  ;;  %1033 = vmatprep.subr.mxu1 %v3593_v50  ;;  %v3603_v29 = vld [vmem:[#allocation33_spill] sm:$0xff]  ;;  %v3604_v50 = vld [vmem:[#allocation66_spill] sm:$0xff] }
  0xc5   : > { %879 = vmatprep.subr.mxu0 %v3594_v19  ;;  %1035 = vmatpush1.msra.mxu1 %v3595_v39  ;;  %v3605_v19 = vld [vmem:[#allocation35_spill] sm:$0xff]  ;;  %v3606_v39 = vld [vmem:[#allocation68_spill] sm:$0xff] }
  0xc6   : > { %882 = vmatpush2.msra.mxu0 %v3596_v60  ;;  %1037 = vmatprep.subr.mxu1 %v3597_v2  ;;  %v3607_v60 = vld [vmem:[#allocation37_spill] sm:$0xff]  ;;  %v3608_v2 = vld [vmem:[#allocation70_spill] sm:$0xff] }
  0xc7   : > { %885 = vmatprep.subr.mxu0 %v3598_v34  ;;  %1039 = vmatpush1.msra.mxu1 %v3599_v56  ;;  %v3609_v34 = vld [vmem:[#allocation39_spill] sm:$0xff]  ;;  %v3610_v56 = vld [vmem:[#allocation72_spill] sm:$0xff] }
  0xc8   : > { %888 = vmatpush2.msra.mxu0 %v3600_v44  ;;  %1041 = vmatprep.subr.mxu1 %v3601_v32  ;;  %v3611_v44 = vld [vmem:[#allocation41_spill] sm:$0xff]  ;;  %v3612_v32 = vld [vmem:[#allocation74_spill] sm:$0xff] }
  0xc9   : > { %891 = vmatprep.subr.mxu0 %v3602_v28  ;;  %1043 = vmatpush1.msra.mxu1 %v3603_v29  ;;  %v3613_v28 = vld [vmem:[#allocation43_spill] sm:$0xff]  ;;  %v3614_v29 = vld [vmem:[#allocation76_spill] sm:$0xff] }
  0xca   : > { %894 = vmatpush2.msra.mxu0 %v3604_v50  ;;  %1045 = vmatprep.subr.mxu1 %v3605_v19  ;;  %v3615_v50 = vld [vmem:[#allocation45_spill] sm:$0xff]  ;;  %v3616_v19 = vld [vmem:[#allocation78_spill] sm:$0xff] }
  0xcb   : > { %897 = vmatprep.subr.mxu0 %v3606_v39  ;;  %1047 = vmatpush1.msra.mxu1 %v3607_v60  ;;  %v3617_v39 = vld [vmem:[#allocation47_spill] sm:$0xff]  ;;  %v3618_v60 = vld [vmem:[#allocation80_spill] sm:$0xff] }
  0xcc   : > { %900 = vmatpush2.msra.mxu0 %v3608_v2  ;;  %1049 = vmatprep.subr.mxu1 %v3609_v34  ;;  %v3619_v2 = vld [vmem:[#allocation49_spill] sm:$0xff]  ;;  %v3620_v34 = vld [vmem:[#allocation82_spill] sm:$0xff] }
  0xcd   : > { %903 = vmatprep.subr.mxu0 %v3610_v56  ;;  %1051 = vmatpush2.msra.mxu1 %v3611_v44  ;;  %v3621_v56 = vld [vmem:[#allocation51_spill] sm:$0xff]  ;;  %v3622_v44 = vld [vmem:[#allocation84_spill] sm:$0xff] }
  0xce   : > { %906 = vmatpush2.msra.mxu0 %v3612_v32  ;;  %1053 = vmatprep.subr.mxu1 %v3613_v28  ;;  %v3623_v32 = vld [vmem:[#allocation53_spill] sm:$0xff]  ;;  %v3624_v28 = vld [vmem:[#allocation86_spill] sm:$0xff] }
  0xcf   : > { %909 = vmatprep.subr.mxu0 %v3614_v29  ;;  %1055 = vmatpush2.msra.mxu1 %v3615_v50  ;;  %v3625_v29 = vld [vmem:[#allocation55_spill] sm:$0xff]  ;;  %v3626_v50 = vld [vmem:[#allocation88_spill] sm:$0xff] }
  0xd0   : > { %912 = vmatpush2.msra.mxu0 %v3616_v19  ;;  %1057 = vmatprep.subr.mxu1 %v3617_v39  ;;  %v3627_v19 = vld [vmem:[#allocation57_spill] sm:$0xff] }
  0xd1   : > { %915 = vmatprep.subr.mxu0 %v3618_v60  ;;  %1059 = vmatpush2.msra.mxu1 %v3619_v2  ;;  %v3628_v39 = vld [vmem:[#allocation89_spill] sm:$0xff]  ;;  %v3629_v60 = vld [vmem:[#allocation59_spill] sm:$0xff] }
  0xd2   : > { %918 = vmatpush2.msra.mxu0 %v3620_v34  ;;  %1061 = vmatprep.subr.mxu1 %v3621_v56  ;;  %v3630_v2 = vld [vmem:[#allocation61_spill] sm:$0xff]  ;;  %v3631_v56 = vld [vmem:[#allocation92_spill] sm:$0xff] }
  0xd3   : > { %921 = vmatprep.subr.mxu0 %v3622_v44  ;;  %1063 = vmatpush2.msra.mxu1 %v3623_v32  ;;  %v3632_v44 = vld [vmem:[#allocation63_spill] sm:$0xff]  ;;  %v3633_v32 = vld [vmem:[#allocation94_spill] sm:$0xff] }
  0xd4   : > { %924 = vmatpush2.msra.mxu0 %v3624_v28  ;;  %1065 = vmatprep.subr.mxu1 %v3625_v29  ;;  %v3634_v28 = vld [vmem:[#allocation65_spill] sm:$0xff]  ;;  %v3635_v29 = vld [vmem:[#allocation67_spill] sm:$0xff] }
  0xd5   : > { %927 = vmatprep.subr.mxu0 %v3626_v50  ;;  %1067 = vmatpush2.msra.mxu1 %v3627_v19  ;;  %v3636_v19 = vld [vmem:[#allocation69_spill] sm:$0xff] }
  0xd6   : > { %930 = vmatpush2.msra.mxu0 %v3628_v39  ;;  %1069 = vmatprep.subr.mxu1 %v3629_v60  ;;  %v3637_v60 = vld [vmem:[#allocation71_spill] sm:$0xff] }
  0xd7   : > { %933 = vmatprep.subr.mxu0 %v2688_v27  ;;  %1071 = vmatpush2.msra.mxu1 %v3630_v2  ;;  %v3638_v2 = vld [vmem:[#allocation73_spill] sm:$0xff] }
  0xd8   : > { %936 = vmatpush2.msra.mxu0 %v3631_v56  ;;  %1073 = vmatprep.subr.mxu1 %v3632_v44  ;;  %v3639_v44 = vld [vmem:[#allocation75_spill] sm:$0xff] }
  0xd9   : > { %939 = vmatprep.subr.mxu0 %v3633_v32  ;;  %1075 = vmatpush2.msra.mxu1 %v3634_v28  ;;  %v3640_v28 = vld [vmem:[#allocation77_spill] sm:$0xff] }
  0xda   : > { %942 = vmatpush2.msra.mxu0 %v2725_v61  ;;  %1077 = vmatprep.subr.mxu1 %v3635_v29  ;;  %v3641_v29 = vld [vmem:[#allocation79_spill] sm:$0xff] }
  0xdb   : > { %945 = vmatprep.subr.mxu0 %v2744_v46  ;;  %1079 = vmatpush2.msra.mxu1 %v3636_v19  ;;  %v3642_v19 = vld [vmem:[#allocation81_spill] sm:$0xff] }
  0xdc   : > { %948 = vmatpush2.msra.mxu0 %v2755_v47  ;;  %1081 = vmatprep.subr.mxu1 %v3637_v60  ;;  %v3643_v60 = vld [vmem:[#allocation83_spill] sm:$0xff] }
  0xdd   : > { %951 = vmatprep.subr.mxu0 %v2767_v20  ;;  %1083 = vmatpush2.msra.mxu1 %v3638_v2 }
  0xde   : > { %954 = vmatpush2.msra.mxu0 %v2777_v41  ;;  %1085 = vmatprep.subr.mxu1 %v3639_v44 }
  0xdf   : > { %957 = vmatprep.subr.mxu0 %v2788_v52  ;;  %1087 = vmatpush2.msra.mxu1 %v3640_v28  ;;  %v3644_v28 = vld [vmem:[#allocation11_spill] sm:$0xff] }
  0xe0   : > { %960 = vmatpush2.msra.mxu0 %v2796_v51  ;;  %1089 = vmatprep.subr.mxu1 %v3641_v29  ;;  %v3645_v29 = vand.u32 4294901760, %v3644_v28  ;;  %v3652_v28 = vand.u32 4294901760, %v2034_v35  ;;  %v3658_v35 = vand.u32 4294901760, %v2784_v49 }
  0xe1   : > { %963 = vmatprep.subr.mxu0 %v2811_v1  ;;  %1091 = vmatpush2.msra.mxu1 %v3642_v19  ;;  %v3646_v19 = vand.u32 4294901760, %v2005_v23  ;;  %v3654_v23 = vand.u32 4294901760, %v2047_v40  ;;  %v3660_v40 = vand.u32 4294901760, %v2110_v8 }
  0xe2   : > { %966 = vmatpush2.msra.mxu0 %v2821_v26  ;;  %1093 = vmatprep.subr.mxu1 %v3643_v60  ;;  %v3647_v26 = vld [vmem:[#allocation90_spill] sm:$0xff]  ;;  %v3648_v60 = vand.u32 4294901760, %v2011_v25  ;;  %v3655_v25 = vand.u32 4294901760, %v2061_v45  ;;  %v3661_v45 = vand.u32 4294901760, %v2121_v42  ;;  %v3676_v42 = vld [vmem:[#allocation15_spill] sm:$0xff] }
  0xe3   : > { %969 = vmatprep.subr.mxu0 %v2833_v62  ;;  %1095 = vmatpush2.msra.mxu1 %v2642_v21  ;;  %v3649_v21 = vld [vmem:[#allocation91_spill] sm:$0xff] }
  0xe4   : > { %972 = vmatpush2.msra.mxu0 %v2840_v33  ;;  %1097 = vmatprep.subr.mxu1 %v2655_v43  ;;  %v3650_v33 = vand.u32 4294901760, %v2025_v31  ;;  %v3651_v43 = vld [vmem:[#allocation93_spill] sm:$0xff]  ;;  %v3656_v31 = vand.u32 4294901760, %v2791_v18  ;;  %v3662_v18 = vand.u32 4294901760, %v2133_v48 }
  0xe5   : > { %978 = vmatmul.mubr.f32.vlgmr.msra.gmra.mxu0 %v2784_v49  ;;  %1128 = vmatprep.subr.mxu0 %v3645_v29  ;;  %v3653_v29 = vld [vmem:[#allocation95_spill] sm:$0xff]  ;;  %v3685_v49 = vld [vmem:[#allocation18_spill] sm:$0xff] }
  0xe6   : > { %1099 = vmatpush2.msra.mxu1 %v2666_v37  ;;  %1132 = vmatpush1.msra.mxu0 %v3646_v19  ;;  %v3659_v19 = vand.u32 4294901760, %v2099_v0  ;;  %v3673_v0 = vld [vmem:[#allocation14_spill] sm:$0xff] }
  0xe7   : > { %1101 = vmatprep.subr.mxu1 %v3647_v26  ;;  %1136 = vmatprep.subr.mxu0 %v3648_v60  ;;  %v3692_v60 = vld [vmem:[#allocation48_spill] sm:$0xff] }
  0xe8   : > { %1103 = vmatpush2.msra.mxu1 %v3649_v21  ;;  %1140 = vmatpush1.msra.mxu0 %v3650_v33  ;;  %v3657_v33 = vand.u32 4294901760, %v2087_v59  ;;  %v3663_v59 = vand.u32 4294901760, %v2147_v57  ;;  %v3680_v57 = vld [vmem:[#allocation40_spill] sm:$0xff] }
  0xe9   : > { %1105 = vmatprep.subr.mxu1 %v3651_v43  ;;  %1144 = vmatprep.subr.mxu0 %v3652_v28  ;;  %v3693_v28 = vand.u32 4294901760, %v3692_v60 }
  0xea   : > { %1107 = vmatpush2.msra.mxu1 %v3653_v29  ;;  %1148 = vmatpush1.msra.mxu0 %v3654_v23  ;;  %v3694_v23 = vld [vmem:[#allocation21_spill] sm:$0xff] }
  0xeb   : > { %1109 = vmatprep.subr.mxu1 %v2734_v14  ;;  %1152 = vmatprep.subr.mxu0 %v3655_v25  ;;  %v3695_v25 = vld [vmem:[#allocation50_spill] sm:$0xff] }
  0xec   : > { %1111 = vmatpush2.msra.mxu1 %v2751_v38  ;;  %1115 = vmatprep.mubr.f32.mxu1 %v3656_v31  ;;  %v3696_v31 = vand.u32 4294901760, %v3695_v25 }
  0xed   : > { %1156 = vmatpush1.msra.mxu0 %v3657_v33  ;;  %1119 = vmatmul.mubr.f32.vlgmr.msra.gmra.mxu1 %v3658_v35  ;;  %v3697_v33 = vld [vmem:[#allocation22_spill] sm:$0xff]  ;;  %v3698_v35 = vld [vmem:[#allocation52_spill] sm:$0xff] }
  0xee   : > { %1160 = vmatprep.subr.mxu0 %v3659_v19  ;;  %1391 = vmatprep.subr.mxu1 %v1972_v3  ;;  %v3664_v3 = vand.u32 4294901760, %v2159_v6  ;;  %v3682_v6 = vld [vmem:[#allocation17_spill] sm:$0xff]  ;;  %v3699_v19 = vand.u32 4294901760, %v3698_v35 }
  0xef   : > { %1164 = vmatpush1.msra.mxu0 %v3660_v40  ;;  %1393 = vmatpush1.msra.mxu1 %v1974_v4  ;;  %v3665_v4 = vand.u32 4294901760, %v2180_v54  ;;  %v3679_v54 = vld [vmem:[#allocation16_spill] sm:$0xff]  ;;  %v3700_v40 = vld [vmem:[#allocation23_spill] sm:$0xff] }
  0xf0   : > { %1168 = vmatprep.subr.mxu0 %v3661_v45  ;;  %1395 = vmatprep.subr.mxu1 %v1976_v5  ;;  %v3666_v5 = vand.u32 4294901760, %v2193_v63  ;;  %v3681_v63 = vand.u32 4294901760, %v3680_v57  ;;  %v3701_v45 = vld [vmem:[#allocation54_spill] sm:$0xff] }
  0xf1   : > { %1172 = vmatpush1.msra.mxu0 %v3662_v18  ;;  %1397 = vmatpush1.msra.mxu1 %v1978_v9  ;;  %v3667_v9 = vand.u32 4294901760, %v2211_v55  ;;  %v3683_v55 = vld [vmem:[#allocation42_spill] sm:$0xff]  ;;  %v3702_v18 = vand.u32 4294901760, %v3701_v45 }
  0xf2   : > { %1176 = vmatprep.subr.mxu0 %v3663_v59  ;;  %1399 = vmatprep.subr.mxu1 %v1980_v10  ;;  %v3668_v10 = vand.u32 4294901760, %v2224_v58  ;;  %v3684_v58 = vand.u32 4294901760, %v3683_v55  ;;  %v3703_v59 = vld [vmem:[#allocation24_spill] sm:$0xff] }
  0xf3   : > { %1180 = vmatpush1.msra.mxu0 %v3664_v3  ;;  %1401 = vmatpush1.msra.mxu1 %v1982_v11  ;;  %v3669_v11 = vand.u32 4294901760, %v3566_v36  ;;  %v3686_v36 = vld [vmem:[#allocation44_spill] sm:$0xff] }
  0xf4   : > { %1184 = vmatprep.subr.mxu0 %v3665_v4  ;;  %1403 = vmatprep.subr.mxu1 %v1985_v15  ;;  %v3670_v15 = vand.u32 4294901760, %v3568_v13  ;;  %v3688_v13 = vld [vmem:[#allocation19_spill] sm:$0xff]  ;;  %v3704_v3 = vld [vmem:[#allocation56_spill] sm:$0xff] }
  0xf5   : > { %1188 = vmatpush1.msra.mxu0 %v3666_v5  ;;  %1405 = vmatpush1.msra.mxu1 %v1987_v16  ;;  %v3671_v16 = vand.u32 4294901760, %v3570_v53  ;;  %v3705_v4 = vand.u32 4294901760, %v3704_v3  ;;  %v3706_v5 = vld [vmem:[#allocation25_spill] sm:$0xff] }
  0xf6   : > { %1192 = vmatprep.subr.mxu0 %v3667_v9  ;;  %1407 = vmatprep.subr.mxu1 %v1989_v17  ;;  %v3672_v17 = vand.u32 4294901760, %v3572_v12  ;;  %v3691_v12 = vld [vmem:[#allocation20_spill] sm:$0xff]  ;;  %v3707_v9 = vld [vmem:[#allocation58_spill] sm:$0xff]  ;;  %v3744_v3 = vld [vmem:[#allocation49_spill] sm:$0xff] }
  0xf7   : > { %1196 = vmatpush1.msra.mxu0 %v3668_v10  ;;  %1409 = vmatpush1.msra.mxu1 %v2002_v22  ;;  %v3674_v22 = vld [vmem:[#allocation36_spill] sm:$0xff]  ;;  %v3708_v10 = vand.u32 4294901760, %v3707_v9  ;;  %v3747_v9 = vld [vmem:[#allocation51_spill] sm:$0xff] }
  0xf8   : > { %1200 = vmatprep.subr.mxu0 %v3669_v11  ;;  %1411 = vmatprep.subr.mxu1 %v2008_v24  ;;  %v3675_v8 = vand.u32 4294901760, %v3674_v22  ;;  %v3677_v24 = vld [vmem:[#allocation38_spill] sm:$0xff] }
  0xf9   : > { %1204 = vmatpush1.msra.mxu0 %v3670_v15  ;;  %1413 = vmatpush1.msra.mxu1 %v3567_v7  ;;  %v3678_v48 = vand.u32 4294901760, %v3677_v24  ;;  %v3687_v7 = vand.u32 4294901760, %v3686_v36  ;;  %v3709_v11 = vld [vmem:[#allocation26_spill] sm:$0xff]  ;;  %v3710_v15 = vld [vmem:[#allocation60_spill] sm:$0xff] }
  0xfa   : > { %1208 = vmatprep.subr.mxu0 %v3671_v16  ;;  %1415 = vmatprep.subr.mxu1 %v3569_v30  ;;  %v3689_v30 = vld [vmem:[#allocation46_spill] sm:$0xff]  ;;  %v3711_v16 = vand.u32 4294901760, %v3710_v15  ;;  %v3750_v15 = vld [vmem:[#allocation53_spill] sm:$0xff] }
  0xfb   : > { %1212 = vmatpush1.msra.mxu0 %v3672_v17  ;;  %1417 = vmatpush1.msra.mxu1 %v3673_v0  ;;  %v3690_v53 = vand.u32 4294901760, %v3689_v30  ;;  %v3712_v17 = vld [vmem:[#allocation27_spill] sm:$0xff]  ;;  %v3713_v0 = vld [vmem:[#allocation62_spill] sm:$0xff] }
  0xfc   : > { %1216 = vmatprep.subr.mxu0 %v3675_v8  ;;  %1419 = vmatprep.subr.mxu1 %v3676_v42  ;;  %v3714_v22 = vand.u32 4294901760, %v3713_v0  ;;  %v3715_v8 = vld [vmem:[#allocation29_spill] sm:$0xff]  ;;  %v3716_v42 = vld [vmem:[#allocation64_spill] sm:$0xff] }
  0xfd   : > { %1220 = vmatpush1.msra.mxu0 %v3678_v48  ;;  %1421 = vmatpush1.msra.mxu1 %v3679_v54  ;;  %v3717_v24 = vand.u32 4294901760, %v3716_v42  ;;  %v3718_v48 = vld [vmem:[#allocation31_spill] sm:$0xff]  ;;  %v3719_v54 = vld [vmem:[#allocation66_spill] sm:$0xff]  ;;  %v3754_v0 = vld [vmem:[#allocation57_spill] sm:$0xff]  ;;  %v3757_v42 = vand.u32 4294901760, %v3631_v56  ;;  %v3765_v56 = vand.u32 4294901760, %v2755_v47 }
  0xfe   : > { %1224 = vmatprep.subr.mxu0 %v3681_v63  ;;  %1423 = vmatprep.subr.mxu1 %v3682_v6  ;;  %v3720_v57 = vand.u32 4294901760, %v3719_v54  ;;  %v3721_v63 = vld [vmem:[#allocation33_spill] sm:$0xff]  ;;  %v3722_v6 = vld [vmem:[#allocation68_spill] sm:$0xff]  ;;  %v3771_v47 = vand.u32 4294901760, %v2796_v51 }
  0xff   : > { %1228 = vmatpush1.msra.mxu0 %v3684_v58  ;;  %1425 = vmatpush1.msra.mxu1 %v3685_v49  ;;  %v3723_v55 = vand.u32 4294901760, %v3722_v6  ;;  %v3724_v58 = vld [vmem:[#allocation35_spill] sm:$0xff]  ;;  %v3725_v49 = vld [vmem:[#allocation70_spill] sm:$0xff]  ;;  %v3762_v54 = vld [vmem:[#allocation65_spill] sm:$0xff] }
 0x100   : > { %1232 = vmatprep.subr.mxu0 %v3687_v7  ;;  %1427 = vmatprep.subr.mxu1 %v3688_v13  ;;  %v3726_v36 = vand.u32 4294901760, %v3725_v49  ;;  %v3727_v7 = vld [vmem:[#allocation37_spill] sm:$0xff]  ;;  %v3728_v13 = vld [vmem:[#allocation72_spill] sm:$0xff]  ;;  %v3768_v6 = vld [vmem:[#allocation71_spill] sm:$0xff] }
 0x101   : > { %1236 = vmatpush1.msra.mxu0 %v3690_v53  ;;  %1429 = vmatpush1.msra.mxu1 %v3691_v12  ;;  %v3729_v30 = vand.u32 4294901760, %v3728_v13  ;;  %v3730_v53 = vld [vmem:[#allocation39_spill] sm:$0xff]  ;;  %v3731_v12 = vld [vmem:[#allocation74_spill] sm:$0xff]  ;;  %v3783_v13 = vld [vmem:[#allocation85_spill] sm:$0xff] }
 0x102   : > { %1240 = vmatprep.subr.mxu0 %v3693_v28  ;;  %1431 = vmatprep.subr.mxu1 %v3694_v23  ;;  %v3732_v60 = vand.u32 4294901760, %v3731_v12  ;;  %v3733_v28 = vld [vmem:[#allocation41_spill] sm:$0xff]  ;;  %v3734_v23 = vld [vmem:[#allocation76_spill] sm:$0xff]  ;;  %v3775_v49 = vld [vmem:[#allocation98_spill] sm:$0xff] }
 0x103   : > { %1244 = vmatpush1.msra.mxu0 %v3696_v31  ;;  %1433 = vmatpush1.msra.mxu1 %v3697_v33  ;;  %v3735_v25 = vand.u32 4294901760, %v3734_v23  ;;  %v3736_v31 = vld [vmem:[#allocation43_spill] sm:$0xff]  ;;  %v3737_v33 = vld [vmem:[#allocation78_spill] sm:$0xff] }
 0x104   : > { %1248 = vmatprep.subr.mxu0 %v3699_v19  ;;  %1435 = vmatprep.subr.mxu1 %v3700_v40  ;;  %v3738_v35 = vand.u32 4294901760, %v3737_v33  ;;  %v3739_v19 = vld [vmem:[#allocation45_spill] sm:$0xff]  ;;  %v3740_v40 = vld [vmem:[#allocation80_spill] sm:$0xff] }
 0x105   : > { %1252 = vmatpush1.msra.mxu0 %v3702_v18  ;;  %1437 = vmatpush1.msra.mxu1 %v3703_v59  ;;  %v3741_v45 = vand.u32 4294901760, %v3740_v40  ;;  %v3742_v18 = vld [vmem:[#allocation47_spill] sm:$0xff]  ;;  %v3743_v59 = vand.u32 4294901760, %v3620_v34  ;;  %v3753_v34 = vand.u32 4294901760, %v3628_v39  ;;  %v3761_v39 = vand.u32 4294901760, %v2725_v61 }
 0x106   : > { %1256 = vmatprep.subr.mxu0 %v3705_v4  ;;  %1439 = vmatprep.subr.mxu1 %v3706_v5  ;;  %v3745_v4 = vld [vmem:[#allocation84_spill] sm:$0xff]  ;;  %v3769_v61 = vand.u32 4294901760, %v2777_v41  ;;  %v3776_v41 = vand.u32 4294901760, %v3775_v49 }
 0x107   : > { %1260 = vmatpush2.msra.mxu0 %v3708_v10  ;;  %1441 = vmatpush1.msra.mxu1 %v3709_v11  ;;  %v3746_v5 = vand.u32 4294901760, %v3745_v4  ;;  %v3748_v10 = vld [vmem:[#allocation86_spill] sm:$0xff] }
 0x108   : > { %1264 = vmatprep.subr.mxu0 %v3711_v16  ;;  %1443 = vmatprep.subr.mxu1 %v3712_v17  ;;  %v3749_v11 = vand.u32 4294901760, %v3748_v10  ;;  %v3751_v16 = vand.u32 4294901760, %v3626_v50  ;;  %v3752_v17 = vld [vmem:[#allocation55_spill] sm:$0xff]  ;;  %v3759_v50 = vand.u32 4294901760, %v3633_v32  ;;  %v3767_v32 = vand.u32 4294901760, %v2767_v20 }
 0x109   : > { %1268 = vmatpush2.msra.mxu0 %v3714_v22  ;;  %1445 = vmatpush1.msra.mxu1 %v3715_v8  ;;  %v3755_v22 = vand.u32 4294901760, %v2688_v27  ;;  %v3756_v8 = vld [vmem:[#allocation59_spill] sm:$0xff]  ;;  %v3763_v27 = vand.u32 4294901760, %v2744_v46  ;;  %v3770_v46 = vand.u32 4294901760, %v2788_v52  ;;  %v3773_v20 = vand.u32 4294901760, %v2811_v1  ;;  %v3784_v1 = vld [vmem:[#allocation96_spill] sm:$0xff] }
 0x10a   : > { %1272 = vmatprep.subr.mxu0 %v3717_v24  ;;  %1447 = vmatprep.subr.mxu1 %v3718_v48  ;;  %v3758_v24 = vld [vmem:[#allocation61_spill] sm:$0xff]  ;;  %v3760_v48 = vld [vmem:[#allocation63_spill] sm:$0xff]  ;;  %v3778_v52 = vand.u32 4294901760, %v2833_v62 }
 0x10b   : > { %1276 = vmatpush2.msra.mxu0 %v3720_v57  ;;  %1449 = vmatpush1.msra.mxu1 %v3721_v63  ;;  %v3764_v57 = vld [vmem:[#allocation67_spill] sm:$0xff]  ;;  %v3766_v63 = vld [vmem:[#allocation69_spill] sm:$0xff] }
 0x10c   : > { %1280 = vmatprep.subr.mxu0 %v3723_v55  ;;  %1451 = vmatprep.subr.mxu1 %v3724_v58  ;;  %v3772_v55 = vld [vmem:[#allocation77_spill] sm:$0xff]  ;;  %v3774_v58 = vld [vmem:[#allocation79_spill] sm:$0xff] }
 0x10d   : > { %1284 = vmatpush2.msra.mxu0 %v3726_v36  ;;  %1453 = vmatpush1.msra.mxu1 %v3727_v7  ;;  %v3777_v36 = vld [vmem:[#allocation81_spill] sm:$0xff] }
 0x10e   : > { %1288 = vmatprep.subr.mxu0 %v3729_v30  ;;  %1455 = vmatprep.subr.mxu1 %v3730_v53  ;;  %v3782_v7 = vld [vmem:[#allocation97_spill] sm:$0xff]  ;;  %v3785_v30 = vld [vmem:[#allocation87_spill] sm:$0xff] }
 0x10f   : > { %1292 = vmatpush2.msra.mxu0 %v3732_v60  ;;  %1457 = vmatpush2.msra.mxu1 %v3733_v28 }
 0x110   : > { %1296 = vmatprep.subr.mxu0 %v3735_v25  ;;  %1459 = vmatprep.subr.mxu1 %v3736_v31 }
 0x111   : > { %1300 = vmatpush2.msra.mxu0 %v3738_v35  ;;  %1461 = vmatpush2.msra.mxu1 %v3739_v19 }
 0x112   : > { %1304 = vmatprep.subr.mxu0 %v3741_v45  ;;  %1463 = vmatprep.subr.mxu1 %v3742_v18 }
 0x113   : > { %1308 = vmatpush2.msra.mxu0 %v3743_v59  ;;  %1465 = vmatpush2.msra.mxu1 %v3744_v3 }
 0x114   : > { %1312 = vmatprep.subr.mxu0 %v3746_v5  ;;  %1467 = vmatprep.subr.mxu1 %v3747_v9 }
 0x115   : > { %1316 = vmatpush2.msra.mxu0 %v3749_v11  ;;  %1469 = vmatpush2.msra.mxu1 %v3750_v15 }
 0x116   : > { %1320 = vmatprep.subr.mxu0 %v3751_v16  ;;  %1471 = vmatprep.subr.mxu1 %v3752_v17 }
 0x117   : > { %1324 = vmatpush2.msra.mxu0 %v3753_v34  ;;  %1473 = vmatpush2.msra.mxu1 %v3754_v0 }
 0x118   : > { %1328 = vmatprep.subr.mxu0 %v3755_v22  ;;  %1475 = vmatprep.subr.mxu1 %v3756_v8 }
 0x119   : > { %1332 = vmatpush2.msra.mxu0 %v3757_v42  ;;  %1477 = vmatpush2.msra.mxu1 %v3758_v24 }
 0x11a   : > { %1336 = vmatprep.subr.mxu0 %v3759_v50  ;;  %1479 = vmatprep.subr.mxu1 %v3760_v48 }
 0x11b   : > { %1340 = vmatpush2.msra.mxu0 %v3761_v39  ;;  %1481 = vmatpush2.msra.mxu1 %v3762_v54 }
 0x11c   : > { %1344 = vmatprep.subr.mxu0 %v3763_v27  ;;  %1483 = vmatprep.subr.mxu1 %v3764_v57 }
 0x11d   : > { %1348 = vmatpush2.msra.mxu0 %v3765_v56  ;;  %1485 = vmatpush2.msra.mxu1 %v3766_v63 }
 0x11e   : > { %1352 = vmatprep.subr.mxu0 %v3767_v32  ;;  %1487 = vmatprep.subr.mxu1 %v3768_v6 }
 0x11f   : > { %1356 = vmatpush2.msra.mxu0 %v3769_v61  ;;  %1489 = vmatpush2.msra.mxu1 %v3638_v2  ;;  %v3779_v2 = vld [vmem:[#allocation83_spill] sm:$0xff] }
 0x120   : > { %1360 = vmatprep.subr.mxu0 %v3770_v46  ;;  %1491 = vmatprep.subr.mxu1 %v3639_v44  ;;  %v3780_v44 = vld [vmem:[#allocation99_spill] sm:$0xff] }
 0x121   : > { %1364 = vmatpush2.msra.mxu0 %v3771_v47  ;;  %1493 = vmatpush2.msra.mxu1 %v3772_v55  ;;  %v3781_v51 = vand.u32 4294901760, %v3780_v44 }
 0x122   : > { %1368 = vmatprep.subr.mxu0 %v3773_v20  ;;  %1495 = vmatprep.subr.mxu1 %v3774_v58 }
 0x123   : > { %1372 = vmatpush2.msra.mxu0 %v3776_v41  ;;  %1497 = vmatpush2.msra.mxu1 %v3777_v36 }
 0x124   : > { %1376 = vmatprep.subr.mxu0 %v3778_v52  ;;  %1499 = vmatprep.subr.mxu1 %v3779_v2 }
 0x125   : > { %1380 = vmatpush2.msra.mxu0 %v3781_v51  ;;  %1382 = vmatprep.mubr.f32.mxu0 %v3782_v7 }
 0x126   : > { %1501 = vmatpush2.msra.mxu1 %v3783_v13  ;;  %1384 = vmatmul.mubr.f32.vlgmr.msra.gmra.mxu0 %v3784_v1 }
 0x127   : > { %1503 = vmatprep.subr.mxu1 %v3785_v30  ;;  %1519 = vmatprep.mubr.f32.mxu1 %v3782_v7 }
 0x128   : > { %1505 = vmatpush2.msra.mxu1 %v2666_v37 }
 0x129   : > { %1507 = vmatprep.subr.mxu1 %v3647_v26 }
 0x12a   : > { %1509 = vmatpush2.msra.mxu1 %v3649_v21 }
 0x12b   : > { %1511 = vmatprep.subr.mxu1 %v3651_v43 }
 0x12c   : > { %1513 = vmatpush2.msra.mxu1 %v3653_v29 }
 0x12d   : > { %1515 = vmatprep.subr.mxu1 %v2734_v14 }
 0x12e   : > { %1517 = vmatpush2.msra.mxu1 %v2751_v38 }
 0x12f   : > { %1521 = vmatmul.mubr.f32.vlgmr.msra.gmra.mxu1 %v3784_v1 }
 0x165   : > { %v383_v62 = vpop.f32.mrf.mxu0 }
 0x167   : > { %v385_v53 = vpop.f32.mrf.mxu0 }
 0x16b   : > { %v776_v12 = vpop.f32.mrf.mxu1 }
 0x16c   : > { %v777_v23 = vadd.f32 %v776_v12, %v383_v62 }
 0x16d   : > { %v778_v28 = vpop.f32.mrf.mxu1 }
 0x16e   : > { %v779_v43 = vadd.f32 %v778_v28, %v385_v53 }
 0x1a5   : > { %v979_v60 = vpop.f32.mrf.mxu0 }
 0x1a6   : > { %v980_v29 = vadd.f32 %v979_v60, %v777_v23 }
 0x1a7   : > { %v981_v37 = vpop.f32.mrf.mxu0 }
 0x1a8   : > { %v982_v31 = vadd.f32 %v981_v37, %v779_v43 }
 0x1ad   : > { %v1120_v26 = vpop.f32.mrf.mxu1 }
 0x1ae   : > { %v1121_v38 = vadd.f32 %v1120_v26, %v980_v29 }
 0x1af   : > { %v1122_v25 = vpop.f32.mrf.mxu1 }
 0x1b0   : > { %v1123_v33 = vadd.f32 %v1122_v25, %v982_v31 }
 0x1e6   : > { %v1385_v21 = vpop.f32.mrf.mxu0 }
 0x1e7   : > { %v1386_v19 = vadd.f32 %v1385_v21, %v1121_v38 }
 0x1e8   : > { %v1387_v14 = vpop.f32.mrf.mxu0 }
 0x1e9   : > { %v1388_v40 = vadd.f32 %v1387_v14, %v1123_v33 }
 0x1ef   : > { %v1522_v35 = vpop.f32.mrf.mxu1 }
 0x1f0   : > { %v1523_v18 = vadd.f32 %v1522_v35, %v1386_v19 }
 0x1f1   : > { %v1524_v45 = vpop.f32.mrf.mxu1 }
 0x1f2   : > { %v1525_v59 = vadd.f32 %v1524_v45, %v1388_v40 }
 0x1f4   : > { %v1529_v3 = vcombine.low %v1523_v18, %v1525_v59 }
 0x1f6   : > { %1531 = vst [vmem:[%s174_s17] sm:$0xff] %v1529_v3 }
 0x1f7   : > { %1772 = shalt.err (!%p1769_p0)
}
 0x1f8   : > { %s1773_s27 = scalar_lea.hbm %s1545_s20, 128  ;;  %s1777_s4 = scalar_lea.hbm %s3222_s2, 256 }
 0x1f9   : > { %p1774_p5 = scmp.ne.s32.totalorder %s1545_s20, %s1773_s27  ;;  %p1778_p1 = scmp.lt.s32.totalorder %s1545_s20, %s3222_s2 }
 0x1fa   : > { %p1779_p4 = scmp.lt.s32.totalorder %s1777_s4, %s1773_s27 }
 0x1fb   : > { %p1775_p9 = pnand %p1774_p5, %p3786_p3 }
 0x1fc   : > { %p1780_p6 = por %p1779_p4, %p1778_p1 }
 0x1fd   : > { %p1776_p12 = pneg %p1775_p9 }
 0x1ff   : > { %p1781_p8 = pnand %p1780_p6, %p1776_p12 }
 0x201   : > { %1784 = shalt.err (!%p1781_p8)
}
 0x202   : > { %1651 = dma.vmem_to_hbm [thread:$0]  (%p3786_p3), %s1548_s8, 128, %s1545_s20, %s1533_s23  }
 0x203 PF: > { %s1559_s7 = sand.u32 1, %s1815_s9   ;;  %p3787_p11 = scmp.ne.s32.totalorder %s3435_s16, 0 }
 0x204   : > { %p3788_p7 = scmp.ge.s32.totalorder %s1827_s12, 2  ;;  %s1560_s14 = scalar_lea.sflag [#allocation4], %s1559_s7 }
 0x206   : > { %p1662_p10 = pnand %p3788_p7, %p3787_p11 }
 0x208   : > { %p1663_p2 = pneg %p1662_p10 }
 0x20a   : > { %1810 = dma.done.wait (%p1663_p2), %s1560_s14, 128  }
 0x20b   : > { %1812 = vsyncadd (%p1663_p2), %s1560_s14, 4294967168  ;;  %p16_p13 = scmp.ge.s32.totalorder %s1903_s21, 4   ;;  %s3789_s9 = smov %s1819_s10 }
 0x20c   : > { %s3790_s10 = smov %s1823_s11  ;;  %s3791_s11 = smov %s1920_s29 }
 0x20d   : > { %s3792_s12 = smov %s1903_s21  ;;  %18 = sbr.rel (!%p16_p13) target bundleno = 6 (0x6), region = 77 }
 0x212   :  { %1565 = vsyncpa [#allocation3], 1 }
 0x213   :  { %1567 = vsyncpa [#allocation3 + $0x1], 1 }
 0x214   :  { %1568 = vsyncpa [#allocation6], 1 }
 0x215   :  { %1569 = vsyncpa [#allocation4], 1 }
 0x216   :  { %1571 = vsyncpa [#allocation4 + $0x1], 1 }

</bundles_post_ra>
